<compile_context>
chip_gen: v5e
topology: v5e:2x2
jax: 0.10.0
libtpu: 0.0.40
codegen_flags: <defaults>
</compile_context>

<pallas_src>
import functools

import jax
import jax.numpy as jnp
from jax.experimental import pallas as pl
from jax.experimental.pallas import tpu as pltpu

LN_EPS = 1e-5
BN_EPS = 1e-5


def _round_up(v, m):
    return (v + m - 1) // m * m


def _choose_tiling(T, halo, tile_req):
    """Pick a time tile (multiple of `halo`) and the padded sequence length."""
    tile = _round_up(max(halo, min(tile_req, max(T, halo))), halo)
    # Prefer a tile that divides T exactly: avoids padding x / slicing output.
    if T >= halo and T % halo == 0:
        cand = tile
        while cand >= max(halo, tile // 2):
            if T % cand == 0:
                return cand, T
            cand -= halo
    return tile, _round_up(T, tile)


def conv_block_kernel(x_prev_ref, x_cur_ref, x_next_ref,
                      ln_g_ref, ln_b_ref,
                      w1a_ref, b1a_ref, w1b_ref, b1b_ref,
                      wdw_ref, bdw_ref,
                      w2_ref, b2_ref,
                      out_ref,
                      *, kernel_size, pad_left, halo, tile_t, seq_len,
                      fused_glu):
    C = out_ref.shape[-1]
    tile_ext = tile_t + 2 * halo
    t = pl.program_id(1)

    # ---- assemble current tile + small aligned halos (all pieces are a
    #      multiple of 8 rows -> aligned vld/vst, no sublane retiling).
    x_ext = jnp.concatenate(
        [x_prev_ref[...], x_cur_ref[...], x_next_ref[...]],
        axis=0).astype(jnp.float32)                         # (tile_ext, C)

    # Global row index of every extended-window row.  Rows outside [0, T)
    # implement the depthwise conv's zero 'same' padding (and the T-rounding
    # rows); they are zeroed in u-space, exactly like PyTorch's zero padding.
    row = (t * tile_t - halo
           + jax.lax.broadcasted_iota(jnp.int32, (tile_ext, 1), 0))
    in_range = jnp.logical_and(row >= 0, row < seq_len)

    # ---- 1) LayerNorm over channels, one-pass statistics (f32)
    inv_c = 1.0 / C
    s1 = jnp.sum(x_ext, axis=-1, keepdims=True)
    s2 = jnp.sum(x_ext * x_ext, axis=-1, keepdims=True)
    mu = s1 * inv_c
    var = jnp.maximum(s2 * inv_c - mu * mu, 0.0)
    xn = ((x_ext - mu) * jax.lax.rsqrt(var + LN_EPS)
          * ln_g_ref[...] + ln_b_ref[...])

    # ---- 2)+3) pointwise Conv1d(C -> 2C) + GLU.  bf16 MXU, f32 accumulate.
    xn_bf = xn.astype(jnp.bfloat16)
    if fused_glu:
        # C % 128 == 0: one (C, 2C) matmul fills the MXU; the value/gate split
        # lands on a 128-lane tile boundary (free slice).
        h = jnp.dot(xn_bf, w1a_ref[...],
                    preferred_element_type=jnp.float32) + b1a_ref[...]
        a = h[:, :C]
        g = h[:, C:]
    else:
        # C < 128: pre-split halves avoid a mid-lane-tile slice.
        a = jnp.dot(xn_bf, w1a_ref[...],
                    preferred_element_type=jnp.float32) + b1a_ref[...]
        g = jnp.dot(xn_bf, w1b_ref[...],
                    preferred_element_type=jnp.float32) + b1b_ref[...]
    u = a * jax.nn.sigmoid(g)                               # (tile_ext, C)
    u = jnp.where(in_range, u, 0.0)     # zero 'same'-padding rows in u-space

    # ---- 4)+5) depthwise Conv1d (inference BatchNorm folded into wdw/bdw).
    # Taps grouped by (k mod 8): one sublane realignment per residue class,
    # then every tap slice inside the group is 8-aligned (no further shuffles).
    wdw = wdw_ref[...]                                      # (K, C), load once
    base = halo - pad_left                                  # >= 0
    acc = None
    for r in range(min(8, kernel_size)):                    # residue classes
        s = base + r
        qn = (kernel_size - 1 - r) // 8 + 1                 # taps in this class
        span = 8 * (qn - 1) + tile_t
        u_r = u[s:s + span, :] if s else u[:span, :]        # one realignment
        for q in range(qn):
            k = 8 * q + r
            term = u_r[8 * q:8 * q + tile_t, :] * wdw[k, :] # aligned slice
            acc = term if acc is None else acc + term
    y = acc + bdw_ref[...]

    # ---- 6) SiLU
    y = y * jax.nn.sigmoid(y)

    # ---- 7) pointwise Conv1d(C -> C), bf16 MXU / f32 accumulate
    y = jnp.dot(y.astype(jnp.bfloat16), w2_ref[...],
                preferred_element_type=jnp.float32) + b2_ref[...]

    # ---- 8) Dropout -> identity at inference
    out_ref[...] = y.astype(out_ref.dtype)


def conv_block(x, params, *, kernel_size, tile_t=1024, interpret=False):
    """x: (B, T, C) channels-last.  params: raw module parameters."""
    (ln_g, ln_b, w1, b1, wdw, bdw,
     bn_g, bn_b, bn_rm, bn_rv, w2, b2) = params
    B, T, C = x.shape
    K = kernel_size
    pad_l = (K - 1) // 2                # matches PyTorch padding='same' split
    pad_r = (K - 1) - pad_l
    f32 = jnp.float32

    # --- one-time wrapper-side preprocessing (O(K*C)) -----------------------
    # Fold inference BatchNorm into the depthwise conv weights/bias.
    s = bn_g.astype(f32) * jax.lax.rsqrt(bn_rv.astype(f32) + BN_EPS)
    wdw_f = wdw.astype(f32) * s[None, :]                    # (K, C)
    bdw_f = ((bdw.astype(f32) - bn_rm.astype(f32)) * s
             + bn_b.astype(f32)).reshape(1, C)

    fused_glu = (C % 128 == 0)
    if fused_glu:
        w1a = w1.astype(jnp.bfloat16)                       # (C, 2C) fused
        b1a = b1.astype(f32).reshape(1, 2 * C)
        w1b = jnp.zeros((1, 1), f32)                        # unused dummies
        b1b = jnp.zeros((1, 1), f32)
    else:
        w1a = w1[:, :C].astype(jnp.bfloat16)                # value half
        w1b = w1[:, C:].astype(jnp.bfloat16)                # gate half
        b1a = b1[:C].astype(f32).reshape(1, C)
        b1b = b1[C:].astype(f32).reshape(1, C)
    w2b = w2.astype(jnp.bfloat16)
    b2v = b2.astype(f32).reshape(1, C)
    ln_gv = ln_g.astype(f32).reshape(1, C)
    ln_bv = ln_b.astype(f32).reshape(1, C)

    # --- row tiling along T with small, 8-aligned halo blocks ----------------
    halo = _round_up(max(pad_l, pad_r, 1), 8)
    tile, T_pad = _choose_tiling(T, halo, tile_t)
    nT = T_pad // tile
    r_blk = tile // halo
    n_halo_blocks = T_pad // halo
    if T_pad != T:
        x = jnp.pad(x, ((0, 0), (0, T_pad - T), (0, 0)))

    kernel = functools.partial(conv_block_kernel, kernel_size=K,
                               pad_left=pad_l, halo=halo, tile_t=tile,
                               seq_len=T, fused_glu=fused_glu)

    def cur_map(b, t):
        return (b, t, 0)

    def prev_map(b, t):       # last `halo` rows of the previous tile
        return (b, jnp.maximum(t * r_blk - 1, 0), 0)

    def next_map(b, t):       # first `halo` rows of the next tile
        return (b, jnp.minimum((t + 1) * r_blk, n_halo_blocks - 1), 0)

    def const2(b, t):
        return (0, 0)

    def full2(a):
        return pl.BlockSpec(a.shape, const2)

    weights = (ln_gv, ln_bv, w1a, b1a, w1b, b1b, wdw_f, bdw_f, w2b, b2v)

    # Rough VMEM budget: double-buffered x/out blocks + weights + f32 temps.
    itemsize = x.dtype.itemsize
    blk_bytes = 2 * ((tile + 2 * halo) * C * itemsize + tile * C * itemsize)
    interm_bytes = 10 * (tile + 2 * halo) * C * 4
    w_bytes = 2 * sum(int(w.size) * int(w.dtype.itemsize) for w in weights)
    vmem_limit = int(min(64 * 2 ** 20,
                         max(16 * 2 ** 20,
                             2 * (blk_bytes + interm_bytes + w_bytes))))
    # TODO(synk): single-buffer the constant weight specs (pl.Buffered(1)) for
    #             very large C on v7x's 64 MiB VMEM.

    cost = pl.CostEstimate(
        flops=int(2 * B * T_pad * C * (3 * C + K)),
        transcendentals=int(2 * B * T_pad * C),
        bytes_accessed=int(2 * B * T_pad * C * itemsize
                           + sum(int(w.size) * int(w.dtype.itemsize)
                                 for w in weights)))

    out = pl.pallas_call(
        kernel,
        out_shape=jax.ShapeDtypeStruct((B, T_pad, C), x.dtype),
        grid=(B, nT),
        in_specs=[pl.BlockSpec((None, halo, C), prev_map),
                  pl.BlockSpec((None, tile, C), cur_map),
                  pl.BlockSpec((None, halo, C), next_map),
                  *(full2(w) for w in weights)],
        out_specs=pl.BlockSpec((None, tile, C), cur_map),
        compiler_params=pltpu.CompilerParams(
            dimension_semantics=("parallel", "parallel"),
            vmem_limit_bytes=vmem_limit),
        cost_estimate=cost,
        interpret=interpret,
    )(x, x, x, *weights)

    return out if T_pad == T else out[:, :T, :]


def conv_block_ref(x, params, kernel_size):
    """Plain-JAX f32 reference, mirrors PyTorch eval-mode forward."""
    (ln_g, ln_b, w1, b1, wdw, bdw,
     bn_g, bn_b, bn_rm, bn_rv, w2, b2) = params
    B, T, C = x.shape
    mu = x.mean(-1, keepdims=True)
    var = ((x - mu) ** 2).mean(-1, keepdims=True)
    xn = (x - mu) * jax.lax.rsqrt(var + LN_EPS) * ln_g + ln_b
    h = xn @ w1 + b1
    u = h[..., :C] * jax.nn.sigmoid(h[..., C:])
    pad_l = (kernel_size - 1) // 2
    pad_r = (kernel_size - 1) - pad_l
    up = jnp.pad(u, ((0, 0), (pad_l, pad_r), (0, 0)))
    acc = sum(up[:, k:k + T, :] * wdw[k] for k in range(kernel_size)) + bdw
    y = (acc - bn_rm) * jax.lax.rsqrt(bn_rv + BN_EPS) * bn_g + bn_b
    y = y * jax.nn.sigmoid(y)
    return y @ w2 + b2


if __name__ == "__main__":
    B, T, C, K = 2, 16, 64, 31                      # inp=64, kernel_size=31

    key = jax.random.PRNGKey(0)
    keys = jax.random.split(key, 13)

    def rnd(k, shape, scale=0.1):
        return scale * jax.random.normal(k, shape, dtype=jnp.float32)

    x = jax.random.normal(keys[0], (B, T, C), dtype=jnp.float32)

    # Deterministic synthetic parameters (shapes follow the module __init__,
    # conv weights pre-transposed to channels-last layout).
    ln_g = 1.0 + rnd(keys[1], (C,))                 # LayerNorm weight
    ln_b = rnd(keys[2], (C,))                       # LayerNorm bias
    w1 = rnd(keys[3], (C, 2 * C))                   # Conv1d(C,2C,1) weight^T
    b1 = rnd(keys[4], (2 * C,))                     # Conv1d(C,2C,1) bias
    wdw = rnd(keys[5], (K, C))                      # depthwise weight (K,C)
    bdw = rnd(keys[6], (C,))                        # depthwise bias
    bn_g = 1.0 + rnd(keys[7], (C,))                 # BN gamma
    bn_b = rnd(keys[8], (C,))                       # BN beta
    bn_rm = rnd(keys[9], (C,))                      # BN running_mean
    bn_rv = 1.0 + 0.1 * jax.random.uniform(keys[10], (C,), dtype=jnp.float32)
    w2 = rnd(keys[11], (C, C))                      # Conv1d(C,C,1) weight^T
    b2 = rnd(keys[12], (C,))                        # Conv1d(C,C,1) bias

    params = (ln_g, ln_b, w1, b1, wdw, bdw,
              bn_g, bn_b, bn_rm, bn_rv, w2, b2)

    out = jax.block_until_ready(conv_block(x, params, kernel_size=K))
    ref = conv_block_ref(x, params, K)

    assert out.shape == (B, T, C)
    # bf16 matmul operands (f32 accumulation) -> compare to f32 ref loosely.
    assert jnp.allclose(out, ref, rtol=2e-2, atol=2e-2), "mismatch vs reference"
    print("KERNEL_OK")
</pallas_src>

<mosaic_0001>
module attributes {stable_mosaic.version = 11 : i64} {
  func.func @conv_block_kernel(%arg0: i32, %arg1: i32, %arg2: memref<1x16x64xf32, #tpu.memory_space<vmem>>, %arg3: memref<1x16x64xf32, #tpu.memory_space<vmem>>, %arg4: memref<1x16x64xf32, #tpu.memory_space<vmem>>, %arg5: memref<1x64xf32, #tpu.memory_space<vmem>>, %arg6: memref<1x64xf32, #tpu.memory_space<vmem>>, %arg7: memref<64x64xbf16, #tpu.memory_space<vmem>>, %arg8: memref<1x64xf32, #tpu.memory_space<vmem>>, %arg9: memref<64x64xbf16, #tpu.memory_space<vmem>>, %arg10: memref<1x64xf32, #tpu.memory_space<vmem>>, %arg11: memref<31x64xf32, #tpu.memory_space<vmem>>, %arg12: memref<1x64xf32, #tpu.memory_space<vmem>>, %arg13: memref<64x64xbf16, #tpu.memory_space<vmem>>, %arg14: memref<1x64xf32, #tpu.memory_space<vmem>>, %arg15: memref<1x16x64xf32, #tpu.memory_space<vmem>>) attributes {dimension_semantics = [#tpu.dimension_semantics<parallel>, #tpu.dimension_semantics<parallel>], iteration_bounds = array<i64: 2, 1>, scalar_prefetch = 0 : i64, scratch_operands = 0 : i64, tpu.core_type = #tpu.core_type<tc>, window_params = [{transform_indices = @transform_0, window_bounds = array<i64: 1, 16, 64>}, {transform_indices = @transform_1, window_bounds = array<i64: 1, 16, 64>}, {transform_indices = @transform_2, window_bounds = array<i64: 1, 16, 64>}, {pipeline_mode = #tpu.pipeline_mode<synchronous>, transform_indices = @transform_3, window_bounds = array<i64: 1, 64>}, {pipeline_mode = #tpu.pipeline_mode<synchronous>, transform_indices = @transform_4, window_bounds = array<i64: 1, 64>}, {pipeline_mode = #tpu.pipeline_mode<synchronous>, transform_indices = @transform_5, window_bounds = array<i64: 64, 64>}, {pipeline_mode = #tpu.pipeline_mode<synchronous>, transform_indices = @transform_6, window_bounds = array<i64: 1, 64>}, {pipeline_mode = #tpu.pipeline_mode<synchronous>, transform_indices = @transform_7, window_bounds = array<i64: 64, 64>}, {pipeline_mode = #tpu.pipeline_mode<synchronous>, transform_indices = @transform_8, window_bounds = array<i64: 1, 64>}, {pipeline_mode = #tpu.pipeline_mode<synchronous>, transform_indices = @transform_9, window_bounds = array<i64: 31, 64>}, {pipeline_mode = #tpu.pipeline_mode<synchronous>, transform_indices = @transform_10, window_bounds = array<i64: 1, 64>}, {pipeline_mode = #tpu.pipeline_mode<synchronous>, transform_indices = @transform_11, window_bounds = array<i64: 64, 64>}, {pipeline_mode = #tpu.pipeline_mode<synchronous>, transform_indices = @transform_12, window_bounds = array<i64: 1, 64>}, {transform_indices = @transform_13, window_bounds = array<i64: 1, 16, 64>}]} {
    %c0 = arith.constant 0 : index
    %c0_0 = arith.constant 0 : index
    %c0_1 = arith.constant 0 : index
    %0 = vector.load %arg2[%c0, %c0_0, %c0_1] : memref<1x16x64xf32, #tpu.memory_space<vmem>>, vector<1x16x64xf32>
    %1 = vector.shape_cast %0 : vector<1x16x64xf32> to vector<16x64xf32>
    %c0_2 = arith.constant 0 : index
    %c0_3 = arith.constant 0 : index
    %c0_4 = arith.constant 0 : index
    %2 = vector.load %arg3[%c0_2, %c0_3, %c0_4] : memref<1x16x64xf32, #tpu.memory_space<vmem>>, vector<1x16x64xf32>
    %3 = vector.shape_cast %2 : vector<1x16x64xf32> to vector<16x64xf32>
    %c0_5 = arith.constant 0 : index
    %c0_6 = arith.constant 0 : index
    %c0_7 = arith.constant 0 : index
    %4 = vector.load %arg4[%c0_5, %c0_6, %c0_7] : memref<1x16x64xf32, #tpu.memory_space<vmem>>, vector<1x16x64xf32>
    %5 = vector.shape_cast %4 : vector<1x16x64xf32> to vector<16x64xf32>
    %6 = tpu.concatenate %1, %3, %5 in 0 : vector<16x64xf32>, vector<16x64xf32>, vector<16x64xf32> -> vector<48x64xf32>
    %c16_i32 = arith.constant 16 : i32
    %7 = arith.muli %arg1, %c16_i32 : i32
    %c16_i32_8 = arith.constant 16 : i32
    %8 = arith.subi %7, %c16_i32_8 : i32
    %9 = tpu.iota {dimensions = array<i32: 0>} : vector<48x1xi32>
    %10 = vector.broadcast %8 : i32 to vector<48x1xi32>
    %11 = arith.addi %10, %9 : vector<48x1xi32>
    %c0_i32 = arith.constant 0 : i32
    %12 = vector.broadcast %c0_i32 : i32 to vector<48x1xi32>
    %13 = arith.cmpi sge, %11, %12 : vector<48x1xi32>
    %c16_i32_9 = arith.constant 16 : i32
    %14 = vector.broadcast %c16_i32_9 : i32 to vector<48x1xi32>
    %15 = arith.cmpi slt, %11, %14 : vector<48x1xi32>
    %16 = arith.andi %13, %15 : vector<48x1xi1>
    %cst = arith.constant dense<0.000000e+00> : vector<48xf32>
    %17 = vector.multi_reduction <add>, %6, %cst [1] : vector<48x64xf32> to vector<48xf32>
    %18 = vector.shape_cast %17 : vector<48xf32> to vector<48x1xf32>
    %19 = arith.mulf %6, %6 : vector<48x64xf32>
    %cst_10 = arith.constant dense<0.000000e+00> : vector<48xf32>
    %20 = vector.multi_reduction <add>, %19, %cst_10 [1] : vector<48x64xf32> to vector<48xf32>
    %21 = vector.shape_cast %20 : vector<48xf32> to vector<48x1xf32>
    %cst_11 = arith.constant 1.562500e-02 : f32
    %22 = vector.broadcast %cst_11 : f32 to vector<48x1xf32>
    %23 = arith.mulf %18, %22 : vector<48x1xf32>
    %cst_12 = arith.constant 1.562500e-02 : f32
    %24 = vector.broadcast %cst_12 : f32 to vector<48x1xf32>
    %25 = arith.mulf %21, %24 : vector<48x1xf32>
    %26 = arith.mulf %23, %23 : vector<48x1xf32>
    %27 = arith.subf %25, %26 : vector<48x1xf32>
    %cst_13 = arith.constant 0.000000e+00 : f32
    %28 = vector.broadcast %cst_13 : f32 to vector<48x1xf32>
    %29 = arith.maximumf %27, %28 : vector<48x1xf32>
    %30 = vector.broadcast %23 : vector<48x1xf32> to vector<48x64xf32>
    %31 = arith.subf %6, %30 : vector<48x64xf32>
    %cst_14 = arith.constant 9.99999974E-6 : f32
    %32 = vector.broadcast %cst_14 : f32 to vector<48x1xf32>
    %33 = arith.addf %29, %32 : vector<48x1xf32>
    %34 = math.rsqrt %33 : vector<48x1xf32>
    %35 = vector.broadcast %34 : vector<48x1xf32> to vector<48x64xf32>
    %36 = arith.mulf %31, %35 : vector<48x64xf32>
    %c0_15 = arith.constant 0 : index
    %c0_16 = arith.constant 0 : index
    %37 = vector.load %arg5[%c0_15, %c0_16] : memref<1x64xf32, #tpu.memory_space<vmem>>, vector<1x64xf32>
    %38 = vector.broadcast %37 : vector<1x64xf32> to vector<48x64xf32>
    %39 = arith.mulf %36, %38 : vector<48x64xf32>
    %c0_17 = arith.constant 0 : index
    %c0_18 = arith.constant 0 : index
    %40 = vector.load %arg6[%c0_17, %c0_18] : memref<1x64xf32, #tpu.memory_space<vmem>>, vector<1x64xf32>
    %41 = vector.broadcast %40 : vector<1x64xf32> to vector<48x64xf32>
    %42 = arith.addf %39, %41 : vector<48x64xf32>
    %43 = arith.truncf %42 : vector<48x64xf32> to vector<48x64xbf16>
    %c0_19 = arith.constant 0 : index
    %c0_20 = arith.constant 0 : index
    %44 = vector.load %arg7[%c0_19, %c0_20] : memref<64x64xbf16, #tpu.memory_space<vmem>>, vector<64x64xbf16>
    %cst_21 = arith.constant dense<0.000000e+00> : vector<48x64xf32>
    %45 = tpu.matmul %43, %44, %cst_21 {dimension_numbers = #tpu.dot_dimension_numbers<[1], [0], [0], [1], [0, 0, 1, 1], [], []>} : vector<48x64xbf16>, vector<64x64xbf16>, vector<48x64xf32> -> vector<48x64xf32>
    %c0_22 = arith.constant 0 : index
    %c0_23 = arith.constant 0 : index
    %46 = vector.load %arg8[%c0_22, %c0_23] : memref<1x64xf32, #tpu.memory_space<vmem>>, vector<1x64xf32>
    %47 = vector.broadcast %46 : vector<1x64xf32> to vector<48x64xf32>
    %48 = arith.addf %45, %47 : vector<48x64xf32>
    %c0_24 = arith.constant 0 : index
    %c0_25 = arith.constant 0 : index
    %49 = vector.load %arg9[%c0_24, %c0_25] : memref<64x64xbf16, #tpu.memory_space<vmem>>, vector<64x64xbf16>
    %cst_26 = arith.constant dense<0.000000e+00> : vector<48x64xf32>
    %50 = tpu.matmul %43, %49, %cst_26 {dimension_numbers = #tpu.dot_dimension_numbers<[1], [0], [0], [1], [0, 0, 1, 1], [], []>} : vector<48x64xbf16>, vector<64x64xbf16>, vector<48x64xf32> -> vector<48x64xf32>
    %c0_27 = arith.constant 0 : index
    %c0_28 = arith.constant 0 : index
    %51 = vector.load %arg10[%c0_27, %c0_28] : memref<1x64xf32, #tpu.memory_space<vmem>>, vector<1x64xf32>
    %52 = vector.broadcast %51 : vector<1x64xf32> to vector<48x64xf32>
    %53 = arith.addf %50, %52 : vector<48x64xf32>
    %54 = arith.negf %53 : vector<48x64xf32>
    %55 = math.exp %54 : vector<48x64xf32>
    %cst_29 = arith.constant 1.000000e+00 : f32
    %56 = vector.broadcast %cst_29 : f32 to vector<48x64xf32>
    %57 = arith.addf %56, %55 : vector<48x64xf32>
    %58 = arith.divf %56, %57 : vector<48x64xf32>
    %59 = arith.mulf %48, %58 : vector<48x64xf32>
    %cst_30 = arith.constant 0.000000e+00 : f32
    %60 = vector.shape_cast %16 : vector<48x1xi1> to vector<48x1xi1>
    %61 = vector.broadcast %60 : vector<48x1xi1> to vector<48x64xi1>
    %62 = vector.broadcast %cst_30 : f32 to vector<48x64xf32>
    %63 = arith.select %61, %59, %62 : vector<48x64xi1>, vector<48x64xf32>
    %c0_31 = arith.constant 0 : index
    %c0_32 = arith.constant 0 : index
    %64 = vector.load %arg11[%c0_31, %c0_32] : memref<31x64xf32, #tpu.memory_space<vmem>>, vector<31x64xf32>
    %65 = vector.extract_strided_slice %63 {offsets = [1, 0], sizes = [40, 64], strides = [1, 1]} : vector<48x64xf32> to vector<40x64xf32>
    %66 = vector.extract_strided_slice %65 {offsets = [0, 0], sizes = [16, 64], strides = [1, 1]} : vector<40x64xf32> to vector<16x64xf32>
    %67 = vector.extract_strided_slice %64 {offsets = [0, 0], sizes = [1, 64], strides = [1, 1]} : vector<31x64xf32> to vector<1x64xf32>
    %68 = vector.shape_cast %67 : vector<1x64xf32> to vector<64xf32>
    %69 = vector.shape_cast %68 : vector<64xf32> to vector<1x64xf32>
    %70 = vector.broadcast %69 : vector<1x64xf32> to vector<16x64xf32>
    %71 = arith.mulf %66, %70 : vector<16x64xf32>
    %72 = vector.extract_strided_slice %65 {offsets = [8, 0], sizes = [16, 64], strides = [1, 1]} : vector<40x64xf32> to vector<16x64xf32>
    %73 = vector.extract_strided_slice %64 {offsets = [8, 0], sizes = [1, 64], strides = [1, 1]} : vector<31x64xf32> to vector<1x64xf32>
    %74 = vector.shape_cast %73 : vector<1x64xf32> to vector<64xf32>
    %75 = vector.shape_cast %74 : vector<64xf32> to vector<1x64xf32>
    %76 = vector.broadcast %75 : vector<1x64xf32> to vector<16x64xf32>
    %77 = arith.mulf %72, %76 : vector<16x64xf32>
    %78 = arith.addf %71, %77 : vector<16x64xf32>
    %79 = vector.extract_strided_slice %65 {offsets = [16, 0], sizes = [16, 64], strides = [1, 1]} : vector<40x64xf32> to vector<16x64xf32>
    %80 = vector.extract_strided_slice %64 {offsets = [16, 0], sizes = [1, 64], strides = [1, 1]} : vector<31x64xf32> to vector<1x64xf32>
    %81 = vector.shape_cast %80 : vector<1x64xf32> to vector<64xf32>
    %82 = vector.shape_cast %81 : vector<64xf32> to vector<1x64xf32>
    %83 = vector.broadcast %82 : vector<1x64xf32> to vector<16x64xf32>
    %84 = arith.mulf %79, %83 : vector<16x64xf32>
    %85 = arith.addf %78, %84 : vector<16x64xf32>
    %86 = vector.extract_strided_slice %65 {offsets = [24, 0], sizes = [16, 64], strides = [1, 1]} : vector<40x64xf32> to vector<16x64xf32>
    %87 = vector.extract_strided_slice %64 {offsets = [24, 0], sizes = [1, 64], strides = [1, 1]} : vector<31x64xf32> to vector<1x64xf32>
    %88 = vector.shape_cast %87 : vector<1x64xf32> to vector<64xf32>
    %89 = vector.shape_cast %88 : vector<64xf32> to vector<1x64xf32>
    %90 = vector.broadcast %89 : vector<1x64xf32> to vector<16x64xf32>
    %91 = arith.mulf %86, %90 : vector<16x64xf32>
    %92 = arith.addf %85, %91 : vector<16x64xf32>
    %93 = vector.extract_strided_slice %63 {offsets = [2, 0], sizes = [40, 64], strides = [1, 1]} : vector<48x64xf32> to vector<40x64xf32>
    %94 = vector.extract_strided_slice %93 {offsets = [0, 0], sizes = [16, 64], strides = [1, 1]} : vector<40x64xf32> to vector<16x64xf32>
    %95 = vector.extract_strided_slice %64 {offsets = [1, 0], sizes = [1, 64], strides = [1, 1]} : vector<31x64xf32> to vector<1x64xf32>
    %96 = vector.shape_cast %95 : vector<1x64xf32> to vector<64xf32>
    %97 = vector.shape_cast %96 : vector<64xf32> to vector<1x64xf32>
    %98 = vector.broadcast %97 : vector<1x64xf32> to vector<16x64xf32>
    %99 = arith.mulf %94, %98 : vector<16x64xf32>
    %100 = arith.addf %92, %99 : vector<16x64xf32>
    %101 = vector.extract_strided_slice %93 {offsets = [8, 0], sizes = [16, 64], strides = [1, 1]} : vector<40x64xf32> to vector<16x64xf32>
    %102 = vector.extract_strided_slice %64 {offsets = [9, 0], sizes = [1, 64], strides = [1, 1]} : vector<31x64xf32> to vector<1x64xf32>
    %103 = vector.shape_cast %102 : vector<1x64xf32> to vector<64xf32>
    %104 = vector.shape_cast %103 : vector<64xf32> to vector<1x64xf32>
    %105 = vector.broadcast %104 : vector<1x64xf32> to vector<16x64xf32>
    %106 = arith.mulf %101, %105 : vector<16x64xf32>
    %107 = arith.addf %100, %106 : vector<16x64xf32>
    %108 = vector.extract_strided_slice %93 {offsets = [16, 0], sizes = [16, 64], strides = [1, 1]} : vector<40x64xf32> to vector<16x64xf32>
    %109 = vector.extract_strided_slice %64 {offsets = [17, 0], sizes = [1, 64], strides = [1, 1]} : vector<31x64xf32> to vector<1x64xf32>
    %110 = vector.shape_cast %109 : vector<1x64xf32> to vector<64xf32>
    %111 = vector.shape_cast %110 : vector<64xf32> to vector<1x64xf32>
    %112 = vector.broadcast %111 : vector<1x64xf32> to vector<16x64xf32>
    %113 = arith.mulf %108, %112 : vector<16x64xf32>
    %114 = arith.addf %107, %113 : vector<16x64xf32>
    %115 = vector.extract_strided_slice %93 {offsets = [24, 0], sizes = [16, 64], strides = [1, 1]} : vector<40x64xf32> to vector<16x64xf32>
    %116 = vector.extract_strided_slice %64 {offsets = [25, 0], sizes = [1, 64], strides = [1, 1]} : vector<31x64xf32> to vector<1x64xf32>
    %117 = vector.shape_cast %116 : vector<1x64xf32> to vector<64xf32>
    %118 = vector.shape_cast %117 : vector<64xf32> to vector<1x64xf32>
    %119 = vector.broadcast %118 : vector<1x64xf32> to vector<16x64xf32>
    %120 = arith.mulf %115, %119 : vector<16x64xf32>
    %121 = arith.addf %114, %120 : vector<16x64xf32>
    %122 = vector.extract_strided_slice %63 {offsets = [3, 0], sizes = [40, 64], strides = [1, 1]} : vector<48x64xf32> to vector<40x64xf32>
    %123 = vector.extract_strided_slice %122 {offsets = [0, 0], sizes = [16, 64], strides = [1, 1]} : vector<40x64xf32> to vector<16x64xf32>
    %124 = vector.extract_strided_slice %64 {offsets = [2, 0], sizes = [1, 64], strides = [1, 1]} : vector<31x64xf32> to vector<1x64xf32>
    %125 = vector.shape_cast %124 : vector<1x64xf32> to vector<64xf32>
    %126 = vector.shape_cast %125 : vector<64xf32> to vector<1x64xf32>
    %127 = vector.broadcast %126 : vector<1x64xf32> to vector<16x64xf32>
    %128 = arith.mulf %123, %127 : vector<16x64xf32>
    %129 = arith.addf %121, %128 : vector<16x64xf32>
    %130 = vector.extract_strided_slice %122 {offsets = [8, 0], sizes = [16, 64], strides = [1, 1]} : vector<40x64xf32> to vector<16x64xf32>
    %131 = vector.extract_strided_slice %64 {offsets = [10, 0], sizes = [1, 64], strides = [1, 1]} : vector<31x64xf32> to vector<1x64xf32>
    %132 = vector.shape_cast %131 : vector<1x64xf32> to vector<64xf32>
    %133 = vector.shape_cast %132 : vector<64xf32> to vector<1x64xf32>
    %134 = vector.broadcast %133 : vector<1x64xf32> to vector<16x64xf32>
    %135 = arith.mulf %130, %134 : vector<16x64xf32>
    %136 = arith.addf %129, %135 : vector<16x64xf32>
    %137 = vector.extract_strided_slice %122 {offsets = [16, 0], sizes = [16, 64], strides = [1, 1]} : vector<40x64xf32> to vector<16x64xf32>
    %138 = vector.extract_strided_slice %64 {offsets = [18, 0], sizes = [1, 64], strides = [1, 1]} : vector<31x64xf32> to vector<1x64xf32>
    %139 = vector.shape_cast %138 : vector<1x64xf32> to vector<64xf32>
    %140 = vector.shape_cast %139 : vector<64xf32> to vector<1x64xf32>
    %141 = vector.broadcast %140 : vector<1x64xf32> to vector<16x64xf32>
    %142 = arith.mulf %137, %141 : vector<16x64xf32>
    %143 = arith.addf %136, %142 : vector<16x64xf32>
    %144 = vector.extract_strided_slice %122 {offsets = [24, 0], sizes = [16, 64], strides = [1, 1]} : vector<40x64xf32> to vector<16x64xf32>
    %145 = vector.extract_strided_slice %64 {offsets = [26, 0], sizes = [1, 64], strides = [1, 1]} : vector<31x64xf32> to vector<1x64xf32>
    %146 = vector.shape_cast %145 : vector<1x64xf32> to vector<64xf32>
    %147 = vector.shape_cast %146 : vector<64xf32> to vector<1x64xf32>
    %148 = vector.broadcast %147 : vector<1x64xf32> to vector<16x64xf32>
    %149 = arith.mulf %144, %148 : vector<16x64xf32>
    %150 = arith.addf %143, %149 : vector<16x64xf32>
    %151 = vector.extract_strided_slice %63 {offsets = [4, 0], sizes = [40, 64], strides = [1, 1]} : vector<48x64xf32> to vector<40x64xf32>
    %152 = vector.extract_strided_slice %151 {offsets = [0, 0], sizes = [16, 64], strides = [1, 1]} : vector<40x64xf32> to vector<16x64xf32>
    %153 = vector.extract_strided_slice %64 {offsets = [3, 0], sizes = [1, 64], strides = [1, 1]} : vector<31x64xf32> to vector<1x64xf32>
    %154 = vector.shape_cast %153 : vector<1x64xf32> to vector<64xf32>
    %155 = vector.shape_cast %154 : vector<64xf32> to vector<1x64xf32>
    %156 = vector.broadcast %155 : vector<1x64xf32> to vector<16x64xf32>
    %157 = arith.mulf %152, %156 : vector<16x64xf32>
    %158 = arith.addf %150, %157 : vector<16x64xf32>
    %159 = vector.extract_strided_slice %151 {offsets = [8, 0], sizes = [16, 64], strides = [1, 1]} : vector<40x64xf32> to vector<16x64xf32>
    %160 = vector.extract_strided_slice %64 {offsets = [11, 0], sizes = [1, 64], strides = [1, 1]} : vector<31x64xf32> to vector<1x64xf32>
    %161 = vector.shape_cast %160 : vector<1x64xf32> to vector<64xf32>
    %162 = vector.shape_cast %161 : vector<64xf32> to vector<1x64xf32>
    %163 = vector.broadcast %162 : vector<1x64xf32> to vector<16x64xf32>
    %164 = arith.mulf %159, %163 : vector<16x64xf32>
    %165 = arith.addf %158, %164 : vector<16x64xf32>
    %166 = vector.extract_strided_slice %151 {offsets = [16, 0], sizes = [16, 64], strides = [1, 1]} : vector<40x64xf32> to vector<16x64xf32>
    %167 = vector.extract_strided_slice %64 {offsets = [19, 0], sizes = [1, 64], strides = [1, 1]} : vector<31x64xf32> to vector<1x64xf32>
    %168 = vector.shape_cast %167 : vector<1x64xf32> to vector<64xf32>
    %169 = vector.shape_cast %168 : vector<64xf32> to vector<1x64xf32>
    %170 = vector.broadcast %169 : vector<1x64xf32> to vector<16x64xf32>
    %171 = arith.mulf %166, %170 : vector<16x64xf32>
    %172 = arith.addf %165, %171 : vector<16x64xf32>
    %173 = vector.extract_strided_slice %151 {offsets = [24, 0], sizes = [16, 64], strides = [1, 1]} : vector<40x64xf32> to vector<16x64xf32>
    %174 = vector.extract_strided_slice %64 {offsets = [27, 0], sizes = [1, 64], strides = [1, 1]} : vector<31x64xf32> to vector<1x64xf32>
    %175 = vector.shape_cast %174 : vector<1x64xf32> to vector<64xf32>
    %176 = vector.shape_cast %175 : vector<64xf32> to vector<1x64xf32>
    %177 = vector.broadcast %176 : vector<1x64xf32> to vector<16x64xf32>
    %178 = arith.mulf %173, %177 : vector<16x64xf32>
    %179 = arith.addf %172, %178 : vector<16x64xf32>
    %180 = vector.extract_strided_slice %63 {offsets = [5, 0], sizes = [40, 64], strides = [1, 1]} : vector<48x64xf32> to vector<40x64xf32>
    %181 = vector.extract_strided_slice %180 {offsets = [0, 0], sizes = [16, 64], strides = [1, 1]} : vector<40x64xf32> to vector<16x64xf32>
    %182 = vector.extract_strided_slice %64 {offsets = [4, 0], sizes = [1, 64], strides = [1, 1]} : vector<31x64xf32> to vector<1x64xf32>
    %183 = vector.shape_cast %182 : vector<1x64xf32> to vector<64xf32>
    %184 = vector.shape_cast %183 : vector<64xf32> to vector<1x64xf32>
    %185 = vector.broadcast %184 : vector<1x64xf32> to vector<16x64xf32>
    %186 = arith.mulf %181, %185 : vector<16x64xf32>
    %187 = arith.addf %179, %186 : vector<16x64xf32>
    %188 = vector.extract_strided_slice %180 {offsets = [8, 0], sizes = [16, 64], strides = [1, 1]} : vector<40x64xf32> to vector<16x64xf32>
    %189 = vector.extract_strided_slice %64 {offsets = [12, 0], sizes = [1, 64], strides = [1, 1]} : vector<31x64xf32> to vector<1x64xf32>
    %190 = vector.shape_cast %189 : vector<1x64xf32> to vector<64xf32>
    %191 = vector.shape_cast %190 : vector<64xf32> to vector<1x64xf32>
    %192 = vector.broadcast %191 : vector<1x64xf32> to vector<16x64xf32>
    %193 = arith.mulf %188, %192 : vector<16x64xf32>
    %194 = arith.addf %187, %193 : vector<16x64xf32>
    %195 = vector.extract_strided_slice %180 {offsets = [16, 0], sizes = [16, 64], strides = [1, 1]} : vector<40x64xf32> to vector<16x64xf32>
    %196 = vector.extract_strided_slice %64 {offsets = [20, 0], sizes = [1, 64], strides = [1, 1]} : vector<31x64xf32> to vector<1x64xf32>
    %197 = vector.shape_cast %196 : vector<1x64xf32> to vector<64xf32>
    %198 = vector.shape_cast %197 : vector<64xf32> to vector<1x64xf32>
    %199 = vector.broadcast %198 : vector<1x64xf32> to vector<16x64xf32>
    %200 = arith.mulf %195, %199 : vector<16x64xf32>
    %201 = arith.addf %194, %200 : vector<16x64xf32>
    %202 = vector.extract_strided_slice %180 {offsets = [24, 0], sizes = [16, 64], strides = [1, 1]} : vector<40x64xf32> to vector<16x64xf32>
    %203 = vector.extract_strided_slice %64 {offsets = [28, 0], sizes = [1, 64], strides = [1, 1]} : vector<31x64xf32> to vector<1x64xf32>
    %204 = vector.shape_cast %203 : vector<1x64xf32> to vector<64xf32>
    %205 = vector.shape_cast %204 : vector<64xf32> to vector<1x64xf32>
    %206 = vector.broadcast %205 : vector<1x64xf32> to vector<16x64xf32>
    %207 = arith.mulf %202, %206 : vector<16x64xf32>
    %208 = arith.addf %201, %207 : vector<16x64xf32>
    %209 = vector.extract_strided_slice %63 {offsets = [6, 0], sizes = [40, 64], strides = [1, 1]} : vector<48x64xf32> to vector<40x64xf32>
    %210 = vector.extract_strided_slice %209 {offsets = [0, 0], sizes = [16, 64], strides = [1, 1]} : vector<40x64xf32> to vector<16x64xf32>
    %211 = vector.extract_strided_slice %64 {offsets = [5, 0], sizes = [1, 64], strides = [1, 1]} : vector<31x64xf32> to vector<1x64xf32>
    %212 = vector.shape_cast %211 : vector<1x64xf32> to vector<64xf32>
    %213 = vector.shape_cast %212 : vector<64xf32> to vector<1x64xf32>
    %214 = vector.broadcast %213 : vector<1x64xf32> to vector<16x64xf32>
    %215 = arith.mulf %210, %214 : vector<16x64xf32>
    %216 = arith.addf %208, %215 : vector<16x64xf32>
    %217 = vector.extract_strided_slice %209 {offsets = [8, 0], sizes = [16, 64], strides = [1, 1]} : vector<40x64xf32> to vector<16x64xf32>
    %218 = vector.extract_strided_slice %64 {offsets = [13, 0], sizes = [1, 64], strides = [1, 1]} : vector<31x64xf32> to vector<1x64xf32>
    %219 = vector.shape_cast %218 : vector<1x64xf32> to vector<64xf32>
    %220 = vector.shape_cast %219 : vector<64xf32> to vector<1x64xf32>
    %221 = vector.broadcast %220 : vector<1x64xf32> to vector<16x64xf32>
    %222 = arith.mulf %217, %221 : vector<16x64xf32>
    %223 = arith.addf %216, %222 : vector<16x64xf32>
    %224 = vector.extract_strided_slice %209 {offsets = [16, 0], sizes = [16, 64], strides = [1, 1]} : vector<40x64xf32> to vector<16x64xf32>
    %225 = vector.extract_strided_slice %64 {offsets = [21, 0], sizes = [1, 64], strides = [1, 1]} : vector<31x64xf32> to vector<1x64xf32>
    %226 = vector.shape_cast %225 : vector<1x64xf32> to vector<64xf32>
    %227 = vector.shape_cast %226 : vector<64xf32> to vector<1x64xf32>
    %228 = vector.broadcast %227 : vector<1x64xf32> to vector<16x64xf32>
    %229 = arith.mulf %224, %228 : vector<16x64xf32>
    %230 = arith.addf %223, %229 : vector<16x64xf32>
    %231 = vector.extract_strided_slice %209 {offsets = [24, 0], sizes = [16, 64], strides = [1, 1]} : vector<40x64xf32> to vector<16x64xf32>
    %232 = vector.extract_strided_slice %64 {offsets = [29, 0], sizes = [1, 64], strides = [1, 1]} : vector<31x64xf32> to vector<1x64xf32>
    %233 = vector.shape_cast %232 : vector<1x64xf32> to vector<64xf32>
    %234 = vector.shape_cast %233 : vector<64xf32> to vector<1x64xf32>
    %235 = vector.broadcast %234 : vector<1x64xf32> to vector<16x64xf32>
    %236 = arith.mulf %231, %235 : vector<16x64xf32>
    %237 = arith.addf %230, %236 : vector<16x64xf32>
    %238 = vector.extract_strided_slice %63 {offsets = [7, 0], sizes = [40, 64], strides = [1, 1]} : vector<48x64xf32> to vector<40x64xf32>
    %239 = vector.extract_strided_slice %238 {offsets = [0, 0], sizes = [16, 64], strides = [1, 1]} : vector<40x64xf32> to vector<16x64xf32>
    %240 = vector.extract_strided_slice %64 {offsets = [6, 0], sizes = [1, 64], strides = [1, 1]} : vector<31x64xf32> to vector<1x64xf32>
    %241 = vector.shape_cast %240 : vector<1x64xf32> to vector<64xf32>
    %242 = vector.shape_cast %241 : vector<64xf32> to vector<1x64xf32>
    %243 = vector.broadcast %242 : vector<1x64xf32> to vector<16x64xf32>
    %244 = arith.mulf %239, %243 : vector<16x64xf32>
    %245 = arith.addf %237, %244 : vector<16x64xf32>
    %246 = vector.extract_strided_slice %238 {offsets = [8, 0], sizes = [16, 64], strides = [1, 1]} : vector<40x64xf32> to vector<16x64xf32>
    %247 = vector.extract_strided_slice %64 {offsets = [14, 0], sizes = [1, 64], strides = [1, 1]} : vector<31x64xf32> to vector<1x64xf32>
    %248 = vector.shape_cast %247 : vector<1x64xf32> to vector<64xf32>
    %249 = vector.shape_cast %248 : vector<64xf32> to vector<1x64xf32>
    %250 = vector.broadcast %249 : vector<1x64xf32> to vector<16x64xf32>
    %251 = arith.mulf %246, %250 : vector<16x64xf32>
    %252 = arith.addf %245, %251 : vector<16x64xf32>
    %253 = vector.extract_strided_slice %238 {offsets = [16, 0], sizes = [16, 64], strides = [1, 1]} : vector<40x64xf32> to vector<16x64xf32>
    %254 = vector.extract_strided_slice %64 {offsets = [22, 0], sizes = [1, 64], strides = [1, 1]} : vector<31x64xf32> to vector<1x64xf32>
    %255 = vector.shape_cast %254 : vector<1x64xf32> to vector<64xf32>
    %256 = vector.shape_cast %255 : vector<64xf32> to vector<1x64xf32>
    %257 = vector.broadcast %256 : vector<1x64xf32> to vector<16x64xf32>
    %258 = arith.mulf %253, %257 : vector<16x64xf32>
    %259 = arith.addf %252, %258 : vector<16x64xf32>
    %260 = vector.extract_strided_slice %238 {offsets = [24, 0], sizes = [16, 64], strides = [1, 1]} : vector<40x64xf32> to vector<16x64xf32>
    %261 = vector.extract_strided_slice %64 {offsets = [30, 0], sizes = [1, 64], strides = [1, 1]} : vector<31x64xf32> to vector<1x64xf32>
    %262 = vector.shape_cast %261 : vector<1x64xf32> to vector<64xf32>
    %263 = vector.shape_cast %262 : vector<64xf32> to vector<1x64xf32>
    %264 = vector.broadcast %263 : vector<1x64xf32> to vector<16x64xf32>
    %265 = arith.mulf %260, %264 : vector<16x64xf32>
    %266 = arith.addf %259, %265 : vector<16x64xf32>
    %267 = vector.extract_strided_slice %63 {offsets = [8, 0], sizes = [32, 64], strides = [1, 1]} : vector<48x64xf32> to vector<32x64xf32>
    %268 = vector.extract_strided_slice %267 {offsets = [0, 0], sizes = [16, 64], strides = [1, 1]} : vector<32x64xf32> to vector<16x64xf32>
    %269 = vector.extract_strided_slice %64 {offsets = [7, 0], sizes = [1, 64], strides = [1, 1]} : vector<31x64xf32> to vector<1x64xf32>
    %270 = vector.shape_cast %269 : vector<1x64xf32> to vector<64xf32>
    %271 = vector.shape_cast %270 : vector<64xf32> to vector<1x64xf32>
    %272 = vector.broadcast %271 : vector<1x64xf32> to vector<16x64xf32>
    %273 = arith.mulf %268, %272 : vector<16x64xf32>
    %274 = arith.addf %266, %273 : vector<16x64xf32>
    %275 = vector.extract_strided_slice %267 {offsets = [8, 0], sizes = [16, 64], strides = [1, 1]} : vector<32x64xf32> to vector<16x64xf32>
    %276 = vector.extract_strided_slice %64 {offsets = [15, 0], sizes = [1, 64], strides = [1, 1]} : vector<31x64xf32> to vector<1x64xf32>
    %277 = vector.shape_cast %276 : vector<1x64xf32> to vector<64xf32>
    %278 = vector.shape_cast %277 : vector<64xf32> to vector<1x64xf32>
    %279 = vector.broadcast %278 : vector<1x64xf32> to vector<16x64xf32>
    %280 = arith.mulf %275, %279 : vector<16x64xf32>
    %281 = arith.addf %274, %280 : vector<16x64xf32>
    %282 = vector.extract_strided_slice %267 {offsets = [16, 0], sizes = [16, 64], strides = [1, 1]} : vector<32x64xf32> to vector<16x64xf32>
    %283 = vector.extract_strided_slice %64 {offsets = [23, 0], sizes = [1, 64], strides = [1, 1]} : vector<31x64xf32> to vector<1x64xf32>
    %284 = vector.shape_cast %283 : vector<1x64xf32> to vector<64xf32>
    %285 = vector.shape_cast %284 : vector<64xf32> to vector<1x64xf32>
    %286 = vector.broadcast %285 : vector<1x64xf32> to vector<16x64xf32>
    %287 = arith.mulf %282, %286 : vector<16x64xf32>
    %288 = arith.addf %281, %287 : vector<16x64xf32>
    %c0_33 = arith.constant 0 : index
    %c0_34 = arith.constant 0 : index
    %289 = vector.load %arg12[%c0_33, %c0_34] : memref<1x64xf32, #tpu.memory_space<vmem>>, vector<1x64xf32>
    %290 = vector.broadcast %289 : vector<1x64xf32> to vector<16x64xf32>
    %291 = arith.addf %288, %290 : vector<16x64xf32>
    %292 = arith.negf %291 : vector<16x64xf32>
    %293 = math.exp %292 : vector<16x64xf32>
    %cst_35 = arith.constant 1.000000e+00 : f32
    %294 = vector.broadcast %cst_35 : f32 to vector<16x64xf32>
    %295 = arith.addf %294, %293 : vector<16x64xf32>
    %296 = arith.divf %294, %295 : vector<16x64xf32>
    %297 = arith.mulf %291, %296 : vector<16x64xf32>
    %298 = arith.truncf %297 : vector<16x64xf32> to vector<16x64xbf16>
    %c0_36 = arith.constant 0 : index
    %c0_37 = arith.constant 0 : index
    %299 = vector.load %arg13[%c0_36, %c0_37] : memref<64x64xbf16, #tpu.memory_space<vmem>>, vector<64x64xbf16>
    %cst_38 = arith.constant dense<0.000000e+00> : vector<16x64xf32>
    %300 = tpu.matmul %298, %299, %cst_38 {dimension_numbers = #tpu.dot_dimension_numbers<[1], [0], [0], [1], [0, 0, 1, 1], [], []>} : vector<16x64xbf16>, vector<64x64xbf16>, vector<16x64xf32> -> vector<16x64xf32>
    %c0_39 = arith.constant 0 : index
    %c0_40 = arith.constant 0 : index
    %301 = vector.load %arg14[%c0_39, %c0_40] : memref<1x64xf32, #tpu.memory_space<vmem>>, vector<1x64xf32>
    %302 = vector.broadcast %301 : vector<1x64xf32> to vector<16x64xf32>
    %303 = arith.addf %300, %302 : vector<16x64xf32>
    %c0_41 = arith.constant 0 : index
    %c0_42 = arith.constant 0 : index
    %c0_43 = arith.constant 0 : index
    %304 = vector.load %arg15[%c0_41, %c0_42, %c0_43] : memref<1x16x64xf32, #tpu.memory_space<vmem>>, vector<1x16x64xf32>
    %305 = vector.shape_cast %304 : vector<1x16x64xf32> to vector<16x64xf32>
    %306 = vector.shape_cast %303 : vector<16x64xf32> to vector<1x16x64xf32>
    tpu.vector_store %arg15[%c0_41, %c0_42, %c0_43], %306 {strides = array<i32>} : memref<1x16x64xf32, #tpu.memory_space<vmem>>, vector<1x16x64xf32>,
    return
  }
  func.func @transform_0(%arg0: i32, %arg1: i32) -> (i32, i32, i32) {
    %c1_i32 = arith.constant 1 : i32
    %0 = arith.muli %arg1, %c1_i32 : i32
    %c1_i32_0 = arith.constant 1 : i32
    %1 = arith.subi %0, %c1_i32_0 : i32
    %c0_i32 = arith.constant 0 : i32
    %2 = arith.maxsi %1, %c0_i32 : i32
    %c0_i32_1 = arith.constant 0 : i32
    %c0_i32_2 = arith.constant 0 : i32
    return %arg0, %2, %c0_i32_1 : i32, i32, i32
  }
  func.func @transform_1(%arg0: i32, %arg1: i32) -> (i32, i32, i32) {
    %c0_i32 = arith.constant 0 : i32
    %c0_i32_0 = arith.constant 0 : i32
    return %arg0, %arg1, %c0_i32 : i32, i32, i32
  }
  func.func @transform_2(%arg0: i32, %arg1: i32) -> (i32, i32, i32) {
    %c1_i32 = arith.constant 1 : i32
    %0 = arith.addi %arg1, %c1_i32 : i32
    %c1_i32_0 = arith.constant 1 : i32
    %1 = arith.muli %0, %c1_i32_0 : i32
    %c0_i32 = arith.constant 0 : i32
    %2 = arith.minsi %1, %c0_i32 : i32
    %c0_i32_1 = arith.constant 0 : i32
    %c0_i32_2 = arith.constant 0 : i32
    return %arg0, %2, %c0_i32_1 : i32, i32, i32
  }
  func.func @transform_3(%arg0: i32, %arg1: i32) -> (i32, i32) {
    %c0_i32 = arith.constant 0 : i32
    %c0_i32_0 = arith.constant 0 : i32
    %c0_i32_1 = arith.constant 0 : i32
    return %c0_i32, %c0_i32_0 : i32, i32
  }
  func.func @transform_4(%arg0: i32, %arg1: i32) -> (i32, i32) {
    %c0_i32 = arith.constant 0 : i32
    %c0_i32_0 = arith.constant 0 : i32
    %c0_i32_1 = arith.constant 0 : i32
    return %c0_i32, %c0_i32_0 : i32, i32
  }
  func.func @transform_5(%arg0: i32, %arg1: i32) -> (i32, i32) {
    %c0_i32 = arith.constant 0 : i32
    %c0_i32_0 = arith.constant 0 : i32
    %c0_i32_1 = arith.constant 0 : i32
    return %c0_i32, %c0_i32_0 : i32, i32
  }
  func.func @transform_6(%arg0: i32, %arg1: i32) -> (i32, i32) {
    %c0_i32 = arith.constant 0 : i32
    %c0_i32_0 = arith.constant 0 : i32
    %c0_i32_1 = arith.constant 0 : i32
    return %c0_i32, %c0_i32_0 : i32, i32
  }
  func.func @transform_7(%arg0: i32, %arg1: i32) -> (i32, i32) {
    %c0_i32 = arith.constant 0 : i32
    %c0_i32_0 = arith.constant 0 : i32
    %c0_i32_1 = arith.constant 0 : i32
    return %c0_i32, %c0_i32_0 : i32, i32
  }
  func.func @transform_8(%arg0: i32, %arg1: i32) -> (i32, i32) {
    %c0_i32 = arith.constant 0 : i32
    %c0_i32_0 = arith.constant 0 : i32
    %c0_i32_1 = arith.constant 0 : i32
    return %c0_i32, %c0_i32_0 : i32, i32
  }
  func.func @transform_9(%arg0: i32, %arg1: i32) -> (i32, i32) {
    %c0_i32 = arith.constant 0 : i32
    %c0_i32_0 = arith.constant 0 : i32
    %c0_i32_1 = arith.constant 0 : i32
    return %c0_i32, %c0_i32_0 : i32, i32
  }
  func.func @transform_10(%arg0: i32, %arg1: i32) -> (i32, i32) {
    %c0_i32 = arith.constant 0 : i32
    %c0_i32_0 = arith.constant 0 : i32
    %c0_i32_1 = arith.constant 0 : i32
    return %c0_i32, %c0_i32_0 : i32, i32
  }
  func.func @transform_11(%arg0: i32, %arg1: i32) -> (i32, i32) {
    %c0_i32 = arith.constant 0 : i32
    %c0_i32_0 = arith.constant 0 : i32
    %c0_i32_1 = arith.constant 0 : i32
    return %c0_i32, %c0_i32_0 : i32, i32
  }
  func.func @transform_12(%arg0: i32, %arg1: i32) -> (i32, i32) {
    %c0_i32 = arith.constant 0 : i32
    %c0_i32_0 = arith.constant 0 : i32
    %c0_i32_1 = arith.constant 0 : i32
    return %c0_i32, %c0_i32_0 : i32, i32
  }
  func.func @transform_13(%arg0: i32, %arg1: i32) -> (i32, i32, i32) {
    %c0_i32 = arith.constant 0 : i32
    %c0_i32_0 = arith.constant 0 : i32
    return %arg0, %arg1, %c0_i32 : i32, i32, i32
  }
}

</mosaic_0001>

<bundles_post_ra>
// kernel: tpu_custom_call.1
= control target key start
LH: loop header
LB: loop body
LE: loop exit
PB: predicated region body
PF: predicated region fallthrough
CT: control target
= control target key end

     0   :  { %s3382_s0 = inlined_call_operand.hbm [shape: f32[2,16,64], index: 0, kind: input, shape index: {}]   ;;  %s3383_s1 = inlined_call_operand.hbm [shape: f32[2,16,64], index: 1, kind: input, shape index: {}]   ;;  %s3384_s2 = inlined_call_operand.hbm [shape: f32[2,16,64], index: 2, kind: input, shape index: {}]   ;;  %s3385_s3 = inlined_call_operand.vmem [shape: f32[1,64], index: 3, kind: input, shape index: {}]   ;;  %s3386_s4 = inlined_call_operand.vmem [shape: f32[1,64], index: 4, kind: input, shape index: {}]   ;;  %s3387_s5 = inlined_call_operand.hbm [shape: bf16[64,64], index: 5, kind: input, shape index: {}]   ;;  %s3388_s6 = inlined_call_operand.vmem [shape: f32[1,64], index: 6, kind: input, shape index: {}]   ;;  %s3389_s7 = inlined_call_operand.hbm [shape: bf16[64,64], index: 7, kind: input, shape index: {}]   ;;  %s3390_s8 = inlined_call_operand.vmem [shape: f32[1,64], index: 8, kind: input, shape index: {}]   ;;  %s3391_s9 = inlined_call_operand.hbm [shape: f32[31,64], index: 9, kind: input, shape index: {}]   ;;  %s3392_s10 = inlined_call_operand.vmem [shape: f32[1,64], index: 10, kind: input, shape index: {}]   ;;  %s3393_s11 = inlined_call_operand.hbm [shape: bf16[64,64], index: 11, kind: input, shape index: {}]   ;;  %s3394_s12 = inlined_call_operand.vmem [shape: f32[1,64], index: 12, kind: input, shape index: {}]   ;;  %s3395_s13 = inlined_call_operand.hbm [shape: f32[2,16,64], index: 13, kind: output, shape index: {}]  }
   0x1   :  { %3417 = sst [smem:[#allocation28_spill]] %s3382_s0 }
   0x2   :  { %3418 = sst [smem:[#allocation29_spill]] %s3383_s1 }
   0x3   :  { %3419 = sst [smem:[#allocation30_spill]] %s3387_s5 }
   0x4   :  { %3420 = sst [smem:[#allocation31_spill]] %s3388_s6 }
   0x5   :  { %3421 = sst [smem:[#allocation32_spill]] %s3389_s7 }
   0x6   :  { %3422 = sst [smem:[#allocation33_spill]] %s3391_s9 }
   0x7   :  { %3423 = sst [smem:[#allocation34_spill]] %s3392_s10 }
   0x8   :  { %3424 = sst [smem:[#allocation35_spill]] %s3393_s11 }
   0x9   :  { %3425 = sst [smem:[#allocation36_spill]] %s3394_s12 }
   0xa   :  { %3426 = sst [smem:[#allocation37_spill]] %s3395_s13 }
   0xb   :  { %18 = vsyncpa [#allocation3], 0 }
   0xc   :  { %20 = vsyncpa [#allocation3 + $0x1], 0 }
   0xd   :  { %21 = vsyncpa [#allocation6], 0 }
   0xe   :  { %23 = vsyncpa [#allocation6 + $0x1], 0 }
   0xf   :  { %24 = vsyncpa [#allocation9], 0 }
  0x10   :  { %25 = vsyncpa [#allocation12], 0 }
  0x11   :  { %26 = vsyncpa [#allocation4], 0 }
  0x12   :  { %28 = vsyncpa [#allocation4 + $0x1], 0  ;;  %s2645_s25 = smov 0   ;;  %s2647_s26 = smov 0  }
  0x13   :  { %s2649_s27 = smov 0   ;;  %s2651_s28 = smov 0  }
  0x14   :  { %s2653_s29 = smov 0   ;;  %s2655_s30 = smov 0  }
  0x15 LB: > { %3427 = sst [smem:[#allocation20_spill]] %s2543_s25  ;;  %s2676_s14 = sadd.s32 4294967295, %s2563_s30   ;;  %s2563_s30 = sphi %s2655_s30, %s34_s30   ;;  %s2559_s29 = sphi %s2653_s29, %s3491_s29   ;;  %s2555_s28 = sphi %s2651_s28, %s3490_s28   ;;  %s2551_s27 = sphi %s2649_s27, %s3494_s27   ;;  %s2547_s26 = sphi %s2647_s26, %s3493_s26   ;;  %s2543_s25 = sphi %s2645_s25, %s3492_s25  }
  0x16   : > { %3428 = sst [smem:[#allocation21_spill]] %s2555_s28  ;;  %s1984_s15 = sadd.s32 4294967294, %s2563_s30  }
  0x17   : > { %3429 = sst [smem:[#allocation22_spill]] %s2559_s29  ;;  %p74_p0 = scmp.ne.s32.totalorder %s2547_s26, %s2543_s25 }
  0x18   : > { %3430 = sst [smem:[#allocation23_spill]] %s2563_s30  ;;  %p75_p1 = scmp.eq.s32.totalorder %s2676_s14, 0 }
  0x19   : > { %p372_p2 = scmp.eq.s32.totalorder %s2676_s14, 1  ;;  %p378_p3 = scmp.eq.s32.totalorder %s1984_s15, 1 }
  0x1a   : > { %p2685_p4 = por %p75_p1, %p74_p0  ;;  %p1985_p5 = scmp.ge.s32.totalorder %s2563_s30, 1 }
  0x1b   : > { %p2690_p6 = por %p378_p3, %p74_p0  ;;  %p385_p7 = scmp.lt.s32.totalorder %s2563_s30, 3 }
  0x1c   : > { %s3434_s5 = sld [smem:[#allocation30_spill]]  ;;  %s2565_s22 = smov [#allocation8]  }
  0x1d   : > { %s3432_s17 = scalar_select %p2690_p6, 1, 0 }
  0x1e   : > { %p2698_p8 = pnand %p1985_p5, %p385_p7  ;;  %s404_s23 = sshll.u32 %s2565_s22, 4  ;;  %s405_s23 = int_to_ptr.vmem [resolvable:$true] %s404_s23 }
  0x1f   : > { %3433 = sst [smem:[#allocation24_spill]] %s3432_s17  ;;  %s3399_s22 = smov 64  }
  0x20   : > { %p2126_p9 = pneg %p2698_p8  ;;  %s3437_s9 = sld [smem:[#allocation33_spill]] }
  0x21   : > { %s2568_s17 = smov [#allocation11]   ;;  %s3403_s13 = smov 128  }
  0x22   : > { %s402_s20 = sshll.u32 %s3434_s5, 4  ;;  %p2706_p10 = pnand %p2126_p9, %p75_p1  ;;  %s403_s20 = int_to_ptr.hbm [resolvable:$true] %s402_s20 }
  0x23   : > { %s3401_s5 = smov 4   ;;  %s438_s25 = sshll.u32 %s2568_s17, 4  ;;  %s439_s25 = int_to_ptr.vmem [resolvable:$true] %s438_s25 }
  0x24   : > { %2129 = dma.hbm_to_vmem [thread:$0]  (!%p2706_p10), %s403_s20, 512, %s405_s23, [#allocation9], %s3399_s22, %s3399_s22, %s3401_s5  }
  0x25   : > { %s3405_s15 = smov 8   ;;  %s46_s18 = sadd.s32 1, %s2559_s29 }
  0x26   : > { %s436_s19 = sshll.u32 %s3437_s9, 4  ;;  %s61_s9 = sadd.s32 1, %s2551_s27  ;;  %s437_s19 = int_to_ptr.hbm [resolvable:$true] %s436_s19 }
  0x27   : > { %2135 = dma.hbm_to_vmem [thread:$0]  (!%p2706_p10), %s437_s19, 512, %s439_s25, [#allocation12], %s3403_s13, %s3403_s13, %s3405_s15  }
  0x28   : > { %p48_p12 = scmp.ge.s32.totalorder %s46_s18, 2  ;;  %p68_p13 = scmp.ne.s32.totalorder %s2551_s27, %s2547_s26 }
  0x29   : > { %p69_p0 = scmp.eq.s32.totalorder %s2563_s30, 0  ;;  %p2157_p3 = scmp.lt.s32.totalorder %s2563_s30, 2 }
  0x2a   : > { %s3496_s18 = smov (%p48_p12, %s46_s18), 0  ;;  %p2734_p7 = por %p372_p2, %p68_p13 }
  0x2b   : > { %3438 = sst [smem:[#allocation25_spill]] %s3496_s18  ;;  %p70_p5 = por %p69_p0, %p68_p13 }
  0x2c   : > { %s3439_s17 = scalar_select %p2734_p7, 1, 0 }
  0x2d   : > { %s56_s20 = ssub.s32 %s2559_s29, %s3496_s18  ;;  %s3410_s23 = sand.u32 1, %s2551_s27  }
  0x2e   : > { %3440 = sst [smem:[#allocation26_spill]] %s3439_s17  ;;  %p59_p9 = scmp.eq.s32.totalorder %s56_s20, 0 }
  0x2f   : > { %s2743_s25 = sshll.u32 %s3410_s23, 4  ;;  %s2746_s19 = sshll.u32 %s2559_s29, 4 }
  0x30   : > { %p2748_p11 = pnand %p2157_p3, %p70_p5  ;;  %s499_s13 = sand.u32 1, %s2563_s30  }
  0x31   : > { %s2753_s5 = scalar_select %p59_p9, %s2551_s27, %s61_s9  }
  0x32   : > { %s3443_s1 = sld [smem:[#allocation29_spill]]  ;;  %s503_s18 = scalar_lea.vmem [#allocation5], %s2743_s25 }
  0x33   : > { %3442 = sst [smem:[#allocation27_spill]] %s2753_s5  ;;  %s513_s23 = sshll.u32 %s503_s18, 4  ;;  %s514_s23 = int_to_ptr.vmem [resolvable:$true] %s513_s23 }
  0x34   : > { %s3444_s7 = sld [smem:[#allocation32_spill]]  ;;  %s2764_s9 = scalar_lea.sflag [#allocation6], %s499_s13 }
  0x35   : > { %s3445_s5 = smov 8   ;;  %s3446_s30 = smov 128  }
  0x36   : > { %s2571_s15 = smov [#allocation10]   ;;  %s3447_s11 = sld [smem:[#allocation35_spill]] }
  0x37   : > { %s421_s18 = sshll.u32 %s2571_s15, 4  ;;  %s3448_s13 = smov 4   ;;  %s422_s18 = int_to_ptr.vmem [resolvable:$true] %s421_s18 }
  0x38   : > { %s510_s20 = scalar_lea.hbm %s3443_s1, %s2746_s19  ;;  %s3449_s28 = smov 64  }
  0x39   : > { %s511_s12 = sshll.u32 %s510_s20, 4  ;;  %s2572_s29 = smov [#allocation13]   ;;  %s512_s12 = int_to_ptr.hbm [resolvable:$true] %s511_s12 }
  0x3a   : > { %s419_s10 = sshll.u32 %s3444_s7, 4  ;;  %s3450_s0 = sld [smem:[#allocation28_spill]]  ;;  %s420_s10 = int_to_ptr.hbm [resolvable:$true] %s419_s10 }
  0x3b   : > { %2145 = dma.hbm_to_vmem [thread:$0]  (!%p2748_p11), %s512_s12, 256, %s514_s23, %s2764_s9, %s3446_s30, %s3446_s30, %s3445_s5  }
  0x3c   : > { %s453_s1 = sshll.u32 %s3447_s11, 4  ;;  %s455_s12 = sshll.u32 %s2572_s29, 4  ;;  %s454_s1 = int_to_ptr.hbm [resolvable:$true] %s453_s1  ;;  %s456_s12 = int_to_ptr.vmem [resolvable:$true] %s455_s12 }
  0x3d   : > { %2132 = dma.hbm_to_vmem [thread:$0]  (!%p2706_p10), %s420_s10, 512, %s422_s18, [#allocation9], %s3449_s28, %s3449_s28, %s3448_s13  }
  0x3e   : > { %2138 = dma.hbm_to_vmem [thread:$0]  (!%p2706_p10), %s454_s1, 512, %s456_s12, [#allocation12], %s3449_s28, %s3449_s28, %s3448_s13  }
  0x3f   : > { %s476_s20 = scalar_lea.vmem [#allocation2], %s2743_s25  ;;  %s3451_s10 = sand.u32 1, %s2551_s27  }
  0x40   : > { %s486_s15 = scalar_lea.hbm %s3450_s0, %s2746_s19  ;;  %s489_s11 = sshll.u32 %s476_s20, 4  ;;  %s490_s11 = int_to_ptr.vmem [resolvable:$true] %s489_s11 }
  0x41   : > { %s487_s17 = sshll.u32 %s486_s15, 4  ;;  %s473_s18 = scalar_lea.sflag [#allocation3], %s3451_s10  ;;  %s488_s17 = int_to_ptr.hbm [resolvable:$true] %s487_s17 }
  0x42   : > { %2142 = dma.hbm_to_vmem [thread:$0]  (!%p2748_p11), %s488_s17, 256, %s490_s11, %s473_s18, %s3446_s30, %s3446_s30, %s3445_s5  }
  0x43   : > { %s537_s24 = scalar_lea.hbm %s3384_s2, %s2746_s19  ;;  %s527_s0 = scalar_lea.vmem [#allocation7], %s2743_s25 }
  0x44   : > { %s538_s23 = sshll.u32 %s537_s24, 4  ;;  %s540_s6 = sshll.u32 %s527_s0, 4  ;;  %s539_s23 = int_to_ptr.hbm [resolvable:$true] %s538_s23  ;;  %s541_s6 = int_to_ptr.vmem [resolvable:$true] %s540_s6 }
  0x45   : > { %2148 = dma.hbm_to_vmem [thread:$0]  (!%p2748_p11), %s539_s23, 256, %s541_s6, %s2764_s9, %s3446_s30, %s3446_s30, %s3445_s5  }
  0x46   : > { %552 = sbr.rel (%p2698_p8) target bundleno = 674 (0x2a2), region = 72  ;;  %s2811_s1 = sand.u32 (!%p2698_p8), 1, %s2547_s26  }
  0x47   : > { %s2814_s11 = sshll.u32 (!%p2698_p8), %s2811_s1, 4  ;;  %s555_s0 = scalar_lea.sflag (!%p2698_p8), [#allocation3], %s2811_s1 }
  0x48   : > { %s558_s25 = scalar_lea.vmem (!%p2698_p8), [#allocation2], %s2814_s11 }
  0x4b   : > { %2522 = dma.done.wait (%p2685_p4), %s555_s0, 256  }
  0x4c   : > { %2524 = vsyncadd (%p2685_p4), %s555_s0, 4294967040  ;;  %s564_s5 = sand.u32 1, %s2676_s14   ;;  %s568_s30 = scalar_lea.vmem [#allocation5], %s2814_s11 }
  0x4d   : > { %s565_s6 = scalar_lea.sflag [#allocation6], %s564_s5 }
  0x4e   : > { %2526 = dma.done.wait (%p2685_p4), %s565_s6, 512  }
  0x4f   : > { %2528 = vsyncadd (%p2685_p4), %s565_s6, 4294966784  ;;  %s578_s21 = scalar_lea.vmem [#allocation7], %s2814_s11 }
  0x50   : > { %2530 = dma.done.wait (%p75_p1), [#allocation9], 1024  }
  0x51   : > { %2532 = vsyncadd (%p75_p1), [#allocation9], 4294966272 }
  0x52   : > { %2534 = dma.done.wait (%p75_p1), [#allocation12], 1024  }
  0x53   : > { %2536 = vsyncadd (%p75_p1), [#allocation12], 4294966272  ;;  %vm703_vm0 = vcmask 523264   ;;  %v2837_v0 = vld [vmem:[%s568_s30] sm:$0xff]  ;;  %v2843_v3 = vld [vmem:[%s568_s30 + $0x8] sm:$0xff]  ;;  %s3452_s15 = sld [smem:[#allocation31_spill]] }
  0x54   : > { %v710_v1 = vsel %vm703_vm0, %v2837_v0, 0.0  ;;  %v724_v2 = vmul.f32 %v2837_v0, %v2837_v0  ;;  %v725_v5 = vmul.f32 %v2843_v3, %v2843_v3  ;;  %v713_v6 = vsel %vm703_vm0, %v2843_v3, 0.0  ;;  %v2084_v8 = vld [vmem:[#allocation8 + $0x18] sm:$0xff]  ;;  %v2083_v12 = vld [vmem:[#allocation8 + $0x10] sm:$0xff]  ;;  %v2082_v17 = vld [vmem:[#allocation8 + $0x8] sm:$0xff]  ;;  %s3479_s10 = sld [smem:[#allocation34_spill]] }
  0x55   : > { %711 = vadd.xlane.f32.xlu0 %v710_v1  ;;  %v2088_v9 = vld [vmem:[#allocation10 + $0x18] sm:$0xff]  ;;  %2094 = vmatpush.bf16.msra.mxu3 %v2084_v8  ;;  %v2087_v13 = vld [vmem:[#allocation10 + $0x10] sm:$0xff]  ;;  %v2086_v18 = vld [vmem:[#allocation10 + $0x8] sm:$0xff]  ;;  %s3480_s18 = sld [smem:[#allocation21_spill]]  ;;  %s1792_s19 = scalar_lea.sflag [#allocation4], %s2811_s1 }
  0x56   : > { %v734_v4 = vsel %vm703_vm0, %v724_v2, 0.0  ;;  %v737_v7 = vsel %vm703_vm0, %v725_v5, 0.0  ;;  %2098 = vmatpush.bf16.msra.mxu1 %v2088_v9  ;;  %926 = vmatpush.bf16.msra.mxu0 %v2084_v8  ;;  %v2081_v21 = vld [vmem:[#allocation8] sm:$0xff]  ;;  %v2865_v31 = vld [vmem:[%s558_s25 + $0x8] sm:$0xff]  ;;  %s3481_s24 = sld [smem:[#allocation36_spill]] }
  0x57   : > { %735 = vadd.xlane.f32.xlu1 %v734_v4  ;;  %v2085_v22 = vld [vmem:[#allocation10] sm:$0xff]  ;;  %v723_v33 = vmul.f32 %v2865_v31, %v2865_v31  ;;  %v2883_v44 = vld [vmem:[%s578_s21 + $0x8] sm:$0xff]  ;;  %v707_v45 = vsel %vm703_vm0, %v2865_v31, 0.0  ;;  %s3483_s30 = sld [smem:[#allocation37_spill]] }
  0x58   : > { %v2861_v30 = vld [vmem:[%s558_s25] sm:$0xff]  ;;  %v719_v47 = vsel %vm703_vm0, %v2883_v44, 0.0  ;;  %v727_v59 = vmul.f32 %v2883_v44, %v2883_v44  ;;  %s651_s25 = scalar_lea.vmem [#allocation14], %s2814_s11 }
  0x59   : > { %2095 = vmatpush.bf16.msra.mxu3 %v2083_v12  ;;  %v704_v32 = vsel %vm703_vm0, %v2861_v30, 0.0  ;;  %v722_v34 = vmul.f32 %v2861_v30, %v2861_v30  ;;  %v731_v37 = vsel %vm703_vm0, %v723_v33, 0.0  ;;  %v2877_v41 = vld [vmem:[%s578_s21] sm:$0xff]  ;;  %s1806_s16 = sshll.u32 %s651_s25, 4  ;;  %s1807_s16 = int_to_ptr.vmem [resolvable:$true] %s1806_s16 }
  0x5a   : > { %2099 = vmatpush.bf16.msra.mxu1 %v2087_v13  ;;  %927 = vmatpush.bf16.msra.mxu0 %v2083_v12  ;;  %v726_v42 = vmul.f32 %v2877_v41, %v2877_v41  ;;  %v716_v54 = vsel %vm703_vm0, %v2877_v41, 0.0  ;;  %v2899_v61 = vld [vmem:[%s3385_s3] ss:$0 sm:$0xff] }
  0x5b   : > { %705 = vadd.xlane.f32.xlu2 %v704_v32  ;;  %v728_v38 = vsel %vm703_vm0, %v722_v34, 0.0  ;;  %v2908_v5 = vld [vmem:[%s3386_s4] ss:$0 sm:$0xff]  ;;  %s2093_s23 = sshll.u32 %s3480_s18, 4 }
  0x5c   : > { %v740_v48 = vsel %vm703_vm0, %v726_v42, 0.0 }
  0x5d   : > { %714 = vadd.xlane.f32.xlu0 %v713_v6  ;;  %2096 = vmatpush.bf16.msra.mxu3 %v2082_v17  ;;  %s3484_s21 = smov %s3483_s30  ;;  %s1805_s14 = scalar_lea.hbm %s3483_s30, %s2093_s23 }
  0x5e   : > { %2100 = vmatpush.bf16.msra.mxu1 %v2086_v18  ;;  %928 = vmatpush.bf16.msra.mxu0 %v2082_v17  ;;  %s1808_s22 = sshll.u32 %s1805_s14, 4  ;;  %s2489_s12 = scalar_lea.hbm %s3484_s21, 32  ;;  %s1809_s22 = int_to_ptr.hbm [resolvable:$true] %s1808_s22 }
  0x5f   : > { %738 = vadd.xlane.f32.xlu1 %v737_v7  ;;  %s2483_s9 = sshra.s32 %s1809_s22, 4  ;;  %s2484_s9 = int_to_ptr.hbm [resolvable:$true] %s2483_s9 }
  0x60   : > { %s2485_s13 = scalar_lea.hbm %s2484_s9, 16  ;;  %p2490_p8 = scmp.lt.s32.totalorder %s2484_s9, %s3484_s21 }
  0x61   : > { %2097 = vmatpush.bf16.msra.mxu3 %v2081_v21  ;;  %p2486_p1 = scmp.ne.s32.totalorder %s2484_s9, %s2485_s13  ;;  %p2491_p10 = scmp.lt.s32.totalorder %s2489_s12, %s2485_s13 }
  0x62   : > { %2101 = vmatpush.bf16.msra.mxu1 %v2085_v22  ;;  %929 = vmatpush.bf16.msra.mxu0 %v2081_v21 }
  0x63   : > { %708 = vadd.xlane.f32.xlu2 %v707_v45  ;;  %p2487_p2 = pnand %p2486_p1, %p2734_p7  ;;  %p2492_p11 = por %p2491_p10, %p2490_p8 }
  0x65   : > { %729 = vadd.xlane.f32.xlu0 %v728_v38  ;;  %p2488_p4 = pneg %p2487_p2 }
  0x66   : > { %986 = vmatpush.bf16.msrb.mxu0 %v2088_v9  ;;  %v2223_v9 = vld [vmem:[%s3390_s8] ss:$0 sm:$0xff] }
  0x67   : > { %732 = vadd.xlane.f32.xlu1 %v731_v37  ;;  %p2493_p12 = pnand %p2492_p11, %p2488_p4 }
  0x6a   : > { %987 = vmatpush.bf16.msrb.mxu0 %v2087_v13  ;;  %v2918_v13 = vld [vmem:[#allocation11] sm:$0xff] }
  0x6b   : > { %717 = vadd.xlane.f32.xlu2 %v716_v54 }
  0x6d   : > { %720 = vadd.xlane.f32.xlu0 %v719_v47 }
  0x6e   : > { %988 = vmatpush.bf16.msrb.mxu0 %v2086_v18 }
  0x6f   : > { %741 = vadd.xlane.f32.xlu1 %v740_v48 }
  0x72   : > { %989 = vmatpush.bf16.msrb.mxu0 %v2085_v22 }
  0xc8   : > { %v712_v10 = vpop.xlane.xlu0 %711 }
  0xc9   : > { %v2851_v11 = vmul.f32 0.015625, %v712_v10 }
  0xca   : > { %v736_v14 = vpop.xlane.xlu1 %735 }
  0xcb   : > { %v760_v15 = vmul.f32 %v2851_v11, %v2851_v11  ;;  %v754_v16 = vmul.f32 0.015625, %v736_v14  ;;  %v778_v57 = vsub.f32 %v2837_v0, %v2851_v11  ;;  %v743_v0 = vsel %vm703_vm0, %v727_v59, 0.0  ;;  %v2920_v14 = vld [vmem:[#allocation11 + $0x8] sm:$0xff] }
  0xcc   : > { %744 = vadd.xlane.f32.xlu2 %v743_v0  ;;  %v2924_v17 = vperm.slane %v2920_v14, 0 }
  0xcd   : > { %v766_v19 = vsub.f32 %v754_v16, %v760_v15  ;;  %v1148_v16 = vperm.slane %v2918_v13, 0 }
  0xce   : > { %v706_v10 = vpop.xlane.xlu2 %705 }
  0xcf   : > { %v772_v20 = vmax.f32 %v766_v19, 0.0  ;;  %v1173_v19 = vperm.slane %v2918_v13, 1  ;;  %v2930_v21 = vmul.f32 0.015625, %v706_v10 }
  0xd0   : > { %v715_v23 = vpop.xlane.xlu0 %714 }
  0xd1   : > { %v784_v24 = vadd.f32 1e-05, %v772_v20  ;;  %v2855_v25 = vmul.f32 0.015625, %v715_v23  ;;  %v2928_v20 = vperm.slane %v2920_v14, 1  ;;  %v758_v33 = vmul.f32 %v2930_v21, %v2930_v21 }
  0xd2   : > { %v739_v26 = vpop.xlane.xlu1 %738  ;;  %v2950_v38 = vmul.f32 0.0, %v1173_v19 }
  0xd3   : > { %2227 = vrsqrt.f32 %v784_v24  ;;  %v761_v27 = vmul.f32 %v2855_v25, %v2855_v25  ;;  %v755_v28 = vmul.f32 0.015625, %v739_v26  ;;  %vm814_vm2 = vweird.f32 %v784_v24 }
  0xd4   : > { %v779_v63 = vsub.f32 %v2843_v3, %v2855_v25  ;;  %v1181_v54 = vrot.slane %v2950_v38, 1 }
  0xd5   : > { %v767_v29 = vsub.f32 %v755_v28, %v761_v27  ;;  %v2936_v28 = vmul.f32 0.0, %v1148_v16 }
  0xd6   : > { %v709_v22 = vpop.xlane.xlu2 %708 }
  0xd7   : > { %v773_v35 = vmax.f32 %v767_v29, 0.0  ;;  %v2932_v25 = vmul.f32 0.015625, %v709_v22  ;;  %v1153_v29 = vmul.f32 0.0, %v2924_v17 }
  0xd8   : > { %v730_v27 = vpop.xlane.xlu0 %729 }
  0xd9   : > { %v2228_v36 = vpop.eup %2227  ;;  %v785_v40 = vadd.f32 1e-05, %v773_v35  ;;  %v752_v34 = vmul.f32 0.015625, %v730_v27  ;;  %v2941_v35 = vld [vmem:[#allocation11 + $0x10] sm:$0xff]  ;;  %v759_v37 = vmul.f32 %v2932_v25, %v2932_v25  ;;  %v2958_v47 = vadd.f32 %v1153_v29, %v2936_v28 }
  0xda   : > { %v809_v39 = vmul.f32 %v2228_v36, %v784_v24  ;;  %vm815_vm1 = vweird.f32 %v2228_v36  ;;  %v733_v23 = vpop.xlane.xlu1 %732  ;;  %v2961_v48 = vperm.slane %v2941_v35, 0 }
  0xdb   : > { %2229 = vrsqrt.f32 %v785_v40  ;;  %vm816_vm3 = vmor %vm814_vm2, %vm815_vm1  ;;  %vm824_vm5 = vweird.f32 %v785_v40  ;;  %v753_v26 = vmul.f32 0.015625, %v733_v23  ;;  %vm1180_vm2 = vcmask 1046528  }
  0xdc   : > { %v810_v43 = vmul.f32 %v2228_v36, %v809_v39  ;;  %v2953_v39 = vmul.f32 0.0, %v2928_v20 }
  0xde   : > { %v811_v46 = vmul.f32 0.5, %v810_v43  ;;  %v764_v43 = vsub.f32 %v752_v34, %v758_v33  ;;  %v2091_v34 = vld [vmem:[#allocation13 + $0x10] sm:$0xff] }
  0xe0   : > { %v812_v49 = vsub.f32 1.5, %v811_v46  ;;  %v765_v46 = vsub.f32 %v753_v26, %v759_v37 }
  0xe1   : > { %v2230_v50 = vpop.eup %2229 }
  0xe2   : > { %v813_v51 = vmul.f32 %v2228_v36, %v812_v49  ;;  %v819_v52 = vmul.f32 %v2230_v50, %v785_v40  ;;  %vm825_vm4 = vweird.f32 %v2230_v50  ;;  %v770_v49 = vmax.f32 %v764_v43, 0.0 }
  0xe3   : > { %vm826_vm6 = vmor %vm824_vm5, %vm825_vm4 }
  0xe4   : > { %v820_v53 = vmul.f32 %v2230_v50, %v819_v52  ;;  %v817_v56 = vsel %vm816_vm3, %v2228_v36, %v813_v51  ;;  %v2224_v36 = vld [vmem:[%s3452_s15] ss:$0 sm:$0xff]  ;;  %v2966_v51 = vperm.slane %v2941_v35, 1  ;;  %v3414_v52 = vperm.slane %v2918_v13, 2 }
  0xe5   : > { %v850_v60 = vmul.f32 %v817_v56, %v778_v57  ;;  %v776_v57 = vsub.f32 %v2861_v30, %v2930_v21  ;;  %v2977_v59 = vadd.f32 1e-05, %v770_v49 }
  0xe6   : > { %v821_v55 = vmul.f32 0.5, %v820_v53  ;;  %v3012_v29 = vmul.f32 0.0, %v2966_v51 }
  0xe7   : > { %v860_v4 = vmul.f32 %v2899_v61, %v850_v60  ;;  %v718_v60 = vpop.xlane.xlu2 %717  ;;  %vm794_vm8 = vweird.f32 %v2977_v59 }
  0xe8   : > { %v822_v58 = vsub.f32 1.5, %v821_v55  ;;  %v2981_v0 = vmul.f32 0.015625, %v718_v60 }
  0xe9   : > { %v870_v7 = vadd.f32 %v2908_v5, %v860_v4 }
  0xea   : > { %v823_v62 = vmul.f32 %v2230_v50, %v822_v58  ;;  %v771_v58 = vmax.f32 %v765_v46, 0.0 }
  0xec   : > { %v827_v1 = vsel %vm826_vm6, %v2230_v50, %v823_v62  ;;  %v2963_v50 = vld [vmem:[#allocation11 + $0x18] sm:$0x7f]  ;;  %v742_v62 = vpop.xlane.xlu1 %741 }
  0xed   : > { %v851_v2 = vmul.f32 %v827_v1, %v779_v63  ;;  %v777_v1 = vsub.f32 %v2865_v31, %v2932_v25  ;;  %v756_v4 = vmul.f32 0.015625, %v742_v62  ;;  %v2089_v25 = vld [vmem:[#allocation13] sm:$0xff] }
  0xef   : > { %v861_v6 = vmul.f32 %v2899_v61, %v851_v2  ;;  %v721_v2 = vpop.xlane.xlu0 %720 }
  0xf0   : > { %v2994_v10 = vmul.f32 0.015625, %v721_v2 }
  0xf1   : > { %v871_v8 = vadd.f32 %v2908_v5, %v861_v6  ;;  %v1166_v6 = vperm.slane %v2963_v50, 0 }
  0xf2   : > { %v763_v43 = vmul.f32 %v2994_v10, %v2994_v10 }
  0xf3   : > { %v875_v3 = vpack.c.bf16 %v871_v8, %v870_v7  ;;  %v2985_v8 = vadd.f32 1e-05, %v771_v58  ;;  %v3006_v23 = vmul.f32 0.0, %v1166_v6 }
  0xf5   : > { %2026 = vmatmul.msk.bf16.vlgmr.msra.gmra.mxu3 %vm703_vm0, %v875_v3  ;;  %2045 = vmatmul.msk.bf16.vlgmr.msra.gmra.mxu1 %vm703_vm0, %v875_v3  ;;  %v2990_v3 = vmul.f32 0.0, %v3414_v52  ;;  %vm804_vm10 = vweird.f32 %v2985_v8 }
 0x13f   : > { %v745_v60 = vpop.xlane.xlu2 %744 }
 0x172   : > { %v996_v11 = vpop.f32.mrf.mxu1 }
 0x173   : > { %v997_v12 = vadd.f32 %v2223_v9, %v996_v11  ;;  %v2997_v11 = vmul.f32 0.0, %v2961_v48 }
 0x175   : > { %v2049_v15 = vmul.f32 -1.442695, %v997_v12  ;;  %v3415_v12 = vperm.slane %v2963_v50, 1 }
 0x177   : > { %2231 = vpow2.f32 %v2049_v15 }
 0x178   : > { %v936_v18 = vpop.f32.mrf.mxu3 }
 0x179   : > { %v2970_v53 = vadd.f32 %v2224_v36, %v936_v18 }
 0x17a   : > { %v998_v24 = vpop.f32.mrf.mxu1 }
 0x17b   : > { %v999_v32 = vadd.f32 %v2223_v9, %v998_v24  ;;  %v762_v9 = vmul.f32 %v2981_v0, %v2981_v0 }
 0x17d   : > { %v2232_v40 = vpop.eup %2231  ;;  %v2050_v42 = vmul.f32 -1.442695, %v999_v32  ;;  %v768_v27 = vsub.f32 %v756_v4, %v762_v9  ;;  %v1230_v32 = vmul.f32 0.0, %v3415_v12 }
 0x17e   : > { %v2955_v45 = vadd.f32 1.0, %v2232_v40  ;;  %v3025_v40 = vperm.slane %v2920_v14, 2 }
 0x17f   : > { %2233 = vpow2.f32 %v2050_v42  ;;  %v774_v58 = vmax.f32 %v768_v27, 0.0  ;;  %v3040_v4 = vrot.slane %v1230_v32, 1 }
 0x180   : > { %2235 = vrcp.f32 %v2955_v45  ;;  %v1071_v56 = vand.u32 2147483648, %v2955_v45  ;;  %v938_v63 = vpop.f32.mrf.mxu3  ;;  %v1069_v7 = vand.u32 2147483647, %v2955_v45  ;;  %vm1065_vm7 = vweird.f32 %v2955_v45 }
 0x181   : > { %2237 = vrsqrt.f32 %v2977_v59  ;;  %v3001_v22 = vadd.f32 %v2224_v36, %v938_v63  ;;  %v3047_v37 = vmul.f32 0.0, %v3025_v40 }
 0x182   : > { %v1072_v18 = vor.u32 1.1754944e-38, %v1071_v56  ;;  %2239 = vrsqrt.f32 %v2985_v8  ;;  %vm3017_vm9 = vcmp.eq.f32.partialorder %v1069_v7, 8.507059e+37 }
 0x185   : > { %v2234_v15 = vpop.eup %2233 }
 0x186   : > { %v2236_v24 = vpop.eup %2235  ;;  %v3008_v26 = vadd.f32 1.0, %v2234_v15  ;;  %v3044_v15 = vadd.f32 1e-05, %v774_v58 }
 0x187   : > { %v1061_v33 = vmul.f32 %v2236_v24, %v2955_v45  ;;  %v3032_v46 = vpop.eup %2237  ;;  %vm1066_vm11 = vweird.f32 %v2236_v24  ;;  %v1272_v45 = vrot.slane %v3047_v37, 2 }
 0x188   : > { %2241 = vrcp.f32 %v3008_v26  ;;  %v1086_v42 = vand.u32 2147483648, %v3008_v26  ;;  %v1084_v62 = vand.u32 2147483647, %v3008_v26  ;;  %v789_v63 = vmul.f32 %v3032_v46, %v2977_v59  ;;  %v3042_v7 = vpop.eup %2239  ;;  %vm1067_vm15 = vmor %vm1065_vm7, %vm1066_vm11 }
 0x189   : > { %v1062_v49 = vsub.f32 1.0, %v1061_v33  ;;  %v757_v33 = vmul.f32 0.015625, %v745_v60  ;;  %v799_v56 = vmul.f32 %v3042_v7, %v2985_v8  ;;  %vm795_vm12 = vweird.f32 %v3032_v46 }
 0x18a   : > { %v3049_v27 = vor.u32 1.1754944e-38, %v1086_v42  ;;  %v790_v52 = vmul.f32 %v3032_v46, %v789_v63  ;;  %vm1080_vm13 = vweird.f32 %v3008_v26  ;;  %vm805_vm14 = vweird.f32 %v3042_v7  ;;  %vm3085_vm5 = vmor %vm794_vm8, %vm795_vm12 }
 0x18b   : > { %v1063_v9 = vmul.f32 %v2236_v24, %v1062_v49  ;;  %2243 = vrsqrt.f32 %v3044_v15  ;;  %v769_v49 = vsub.f32 %v757_v33, %v763_v43  ;;  %v800_v42 = vmul.f32 %v3042_v7, %v799_v56  ;;  %v2092_v33 = vld [vmem:[#allocation13 + $0x18] sm:$0xff]  ;;  %vm3101_vm6 = vmor %vm804_vm10, %vm805_vm14 }
 0x18c   : > { %v791_v60 = vmul.f32 0.5, %v790_v52  ;;  %v3063_v63 = vperm.slane %v2941_v35, 2  ;;  %vm3067_vm1 = vcmp.eq.f32.partialorder %v1084_v62, 8.507059e+37  ;;  %vm834_vm3 = vweird.f32 %v3044_v15  ;;  %1779 = vmatpush.bf16.msra.mxu2 %v2092_v33 }
 0x18d   : > { %v1064_v32 = vadd.f32 %v2236_v24, %v1063_v9  ;;  %v3416_v9 = vperm.slane %v2963_v50, 2  ;;  %v775_v43 = vmax.f32 %v769_v49, 0.0  ;;  %v801_v56 = vmul.f32 0.5, %v800_v42 }
 0x18e   : > { %v2242_v58 = vpop.eup %2241  ;;  %v792_v55 = vsub.f32 1.5, %v791_v60  ;;  %vm1253_vm12 = vcmask 1045504   ;;  %vm1326_vm14 = vcmask 1044480  }
 0x18f   : > { %v1068_v2 = vsel %vm1067_vm15, %v2236_v24, %v1064_v32  ;;  %v1076_v12 = vmul.f32 %v2242_v58, %v3008_v26  ;;  %v3076_v24 = vmul.f32 0.0, %v3063_v63  ;;  %vm1081_vm4 = vweird.f32 %v2242_v58 }
 0x190   : > { %v1073_v52 = vsel %vm3017_vm9, %v1072_v18, %v1068_v2  ;;  %v3089_v18 = vadd.f32 1e-05, %v775_v43  ;;  %v802_v2 = vsub.f32 1.5, %v801_v56  ;;  %v793_v42 = vmul.f32 %v3032_v46, %v792_v55  ;;  %1780 = vmatpush.bf16.msra.mxu2 %v2091_v34  ;;  %vm1082_vm8 = vmor %vm1080_vm13, %vm1081_vm4 }
 0x191   : > { %v3079_v62 = vmul.f32 %v1073_v52, %v2970_v53  ;;  %v1077_v32 = vsub.f32 1.0, %v1076_v12  ;;  %v3095_v12 = vmul.f32 0.0, %v3416_v9  ;;  %v2244_v60 = vpop.eup %2243  ;;  %v2090_v9 = vld [vmem:[#allocation13 + $0x8] sm:$0xff]  ;;  %vm1399_vm15 = vcmask 1043456  }
 0x192   : > { %2245 = vrsqrt.f32 %v3089_v18  ;;  %v803_v33 = vmul.f32 %v3042_v7, %v802_v2  ;;  %v829_v56 = vmul.f32 %v2244_v60, %v3044_v15  ;;  %vm835_vm7 = vweird.f32 %v2244_v60 }
 0x193   : > { %v1078_v52 = vmul.f32 %v2242_v58, %v1077_v32  ;;  %v1151_v55 = vmul.f32 %v1148_v16, %v3079_v62  ;;  %v797_v8 = vsel %vm3085_vm5, %v3032_v46, %v793_v42  ;;  %v1154_v16 = vmul.f32 %v2924_v17, %v3079_v62  ;;  %vm3155_vm11 = vmor %vm834_vm3, %vm835_vm7 }
 0x194   : > { %v848_v53 = vmul.f32 %v797_v8, %v776_v57  ;;  %v1160_v2 = vmul.f32 %v2961_v48, %v3079_v62  ;;  %v830_v43 = vmul.f32 %v2244_v60, %v829_v56  ;;  %vm844_vm9 = vweird.f32 %v3089_v18  ;;  %1781 = vmatpush.bf16.msra.mxu2 %v2090_v9 }
 0x195   : > { %v1079_v32 = vadd.f32 %v2242_v58, %v1078_v52  ;;  %v807_v30 = vsel %vm3101_vm6, %v3042_v7, %v803_v33  ;;  %v1176_v21 = vmul.f32 %v1173_v19, %v3079_v62  ;;  %v1194_v57 = vmul.f32 %v2928_v20, %v3079_v62 }
 0x196   : > { %v849_v26 = vmul.f32 %v807_v30, %v777_v1  ;;  %v858_v49 = vmul.f32 %v2899_v61, %v848_v53  ;;  %v1157_v34 = vadd.f32 %v1154_v16, %v2936_v28  ;;  %v831_v42 = vmul.f32 0.5, %v830_v43 }
 0x197   : > { %v1083_v46 = vsel %vm1082_vm8, %v2242_v58, %v1079_v32  ;;  %v1163_v52 = vadd.f32 %v1160_v2, %v2958_v47  ;;  %v1184_v19 = vrot.slane %v1176_v21, 1  ;;  %v1200_v1 = vrot.slane %v1194_v57, 1 }
 0x198   : > { %v1088_v7 = vsel %vm3067_vm1, %v3049_v27, %v1083_v46  ;;  %v2246_v59 = vpop.eup %2245  ;;  %v859_v58 = vmul.f32 %v2899_v61, %v849_v26  ;;  %v868_v31 = vadd.f32 %v2908_v5, %v858_v49  ;;  %v832_v28 = vsub.f32 1.5, %v831_v42  ;;  %1782 = vmatpush.bf16.msra.mxu2 %v2089_v25 }
 0x199   : > { %v3144_v33 = vmul.f32 %v1088_v7, %v3001_v22  ;;  %v839_v53 = vmul.f32 %v2246_v59, %v3089_v18  ;;  %vm845_vm10 = vweird.f32 %v2246_v59  ;;  %v1185_v47 = vsel %vm1180_vm2, %v1181_v54, %v1184_v19 }
 0x19a   : > { %v869_v36 = vadd.f32 %v2908_v5, %v859_v58  ;;  %v833_v56 = vmul.f32 %v2244_v60, %v832_v28  ;;  %v3463_v32 = vrot.slane %v2953_v39, 1  ;;  %v1211_v46 = vmul.f32 %v2966_v51, %v3079_v62  ;;  %vm3193_vm13 = vmor %vm844_vm9, %vm845_vm10 }
 0x19b   : > { %v1155_v27 = vmul.f32 %v2924_v17, %v3144_v33  ;;  %v1161_v9 = vmul.f32 %v2961_v48, %v3144_v33  ;;  %v1167_v43 = vmul.f32 %v1166_v6, %v3144_v33  ;;  %v840_v8 = vmul.f32 %v2246_v59, %v839_v53 }
 0x19c   : > { %v1195_v15 = vmul.f32 %v2928_v20, %v3144_v33  ;;  %v1201_v16 = vsel %vm1180_vm2, %v3463_v32, %v1200_v1  ;;  %v3172_v2 = vpack.c.bf16 %v869_v36, %v868_v31  ;;  %v837_v48 = vsel %vm3155_vm11, %v2244_v60, %v833_v56 }
 0x19d   : > { %v1158_v17 = vadd.f32 %v1155_v27, %v1151_v55  ;;  %v1164_v30 = vadd.f32 %v1161_v9, %v1157_v34  ;;  %v1170_v21 = vadd.f32 %v1167_v43, %v1163_v52  ;;  %v841_v6 = vmul.f32 0.5, %v840_v8 }
 0x19e   : > { %v1202_v57 = vrot.slane %v1195_v15, 1  ;;  %2025 = vmatmul.msk.bf16.vlgmr.msra.gmra.mxu0 %vm703_vm0, %v3172_v2  ;;  %v3464_v20 = vsub.f32 %v2877_v41, %v2981_v0  ;;  %v1212_v7 = vmul.f32 %v2966_v51, %v3144_v33  ;;  %v1217_v42 = vrot.slane %v1211_v46, 1 }
 0x19f   : > { %v1165_v55 = vadd.f32 %v2997_v11, %v1158_v17  ;;  %v1171_v26 = vadd.f32 %v3006_v23, %v1164_v30  ;;  %v1189_v49 = vadd.f32 %v1181_v54, %v1170_v21  ;;  %v842_v60 = vsub.f32 1.5, %v841_v6 }
 0x1a0   : > { %v852_v39 = vmul.f32 %v837_v48, %v3464_v20  ;;  %v1203_v34 = vsel %vm1180_vm2, %v1200_v1, %v1202_v57  ;;  %v1218_v58 = vrot.slane %v1212_v7, 1  ;;  %v3467_v31 = vperm.slane %v2963_v50, 1 }
 0x1a1   : > { %v1172_v11 = vadd.f32 %v3006_v23, %v1165_v55  ;;  %v1190_v38 = vadd.f32 %v1185_v47, %v1171_v26  ;;  %v1207_v54 = vadd.f32 %v1201_v16, %v1189_v49  ;;  %v843_v52 = vmul.f32 %v2246_v59, %v842_v60 }
 0x1a2   : > { %v862_v0 = vmul.f32 %v2899_v61, %v852_v39  ;;  %v1229_v51 = vmul.f32 %v3467_v31, %v3144_v33  ;;  %v3468_v25 = vperm.slane %v2918_v13, 2  ;;  %v1267_v22 = vmul.f32 %v3025_v40, %v3079_v62 }
 0x1a3   : > { %v1191_v28 = vadd.f32 %v1184_v19, %v1172_v11  ;;  %v1208_v53 = vadd.f32 %v1203_v34, %v1190_v38  ;;  %v847_v23 = vsel %vm3193_vm13, %v2246_v59, %v843_v52  ;;  %v1219_v47 = vsel %vm1180_vm2, %v1217_v42, %v1218_v58 }
 0x1a4   : > { %v1249_v18 = vmul.f32 %v3468_v25, %v3079_v62  ;;  %v872_v1 = vadd.f32 %v2908_v5, %v862_v0  ;;  %v3469_v36 = vrot.slane %v3012_v29, 1  ;;  %v1235_v9 = vrot.slane %v1229_v51, 1 }
 0x1a5   : > { %v3470_v43 = vsub.f32 %v2883_v44, %v2994_v10  ;;  %v1209_v8 = vadd.f32 %v1202_v57, %v1191_v28  ;;  %v1225_v19 = vadd.f32 %v1219_v47, %v1207_v54  ;;  %v1268_v59 = vmul.f32 %v3025_v40, %v3144_v33 }
 0x1a6   : > { %v1221_v27 = vsel %vm1180_vm2, %v1218_v58, %v3469_v36  ;;  %v1237_v32 = vsel %vm1180_vm2, %v1235_v9, %v3040_v4  ;;  %v1257_v16 = vrot.slane %v1249_v18, 2  ;;  %v1273_v17 = vrot.slane %v1267_v22, 2 }
 0x1a7   : > { %v853_v56 = vmul.f32 %v847_v23, %v3470_v43  ;;  %v1226_v15 = vadd.f32 %v1221_v27, %v1208_v53  ;;  %v3471_v21 = vmov %v3469_v36  ;;  %v1243_v6 = vadd.f32 %v1237_v32, %v1225_v19 }
 0x1a8   : > { %v1227_v48 = vadd.f32 %v3471_v21, %v1209_v8  ;;  %v3472_v10 = vrot.slane %v2990_v3, 2  ;;  %v1274_v46 = vsel %vm1253_vm12, %v1272_v45, %v1273_v17  ;;  %v1275_v20 = vrot.slane %v1268_v59, 2 }
 0x1a9   : > { %v863_v30 = vmul.f32 %v2899_v61, %v853_v56  ;;  %v1244_v44 = vadd.f32 %v3040_v4, %v1226_v15  ;;  %v1284_v40 = vmul.f32 %v3063_v63, %v3079_v62  ;;  %v1285_v60 = vmul.f32 %v3063_v63, %v3144_v33 }
 0x1aa   : > { %v1258_v57 = vsel %vm1253_vm12, %v3472_v10, %v1257_v16  ;;  %v1245_v29 = vadd.f32 %v3040_v4, %v1227_v48  ;;  %v3473_v39 = vmov %v3472_v10  ;;  %v1276_v49 = vsel %vm1253_vm12, %v1273_v17, %v1275_v20 }
 0x1ab   : > { %v873_v61 = vadd.f32 %v2908_v5, %v863_v30  ;;  %v1262_v55 = vadd.f32 %v3473_v39, %v1243_v6  ;;  %v1263_v26 = vadd.f32 %v1258_v57, %v1244_v44  ;;  %v1290_v37 = vrot.slane %v1284_v40, 2 }
 0x1ac   : > { %v3474_v45 = vperm.slane %v2963_v50, 2  ;;  %v1264_v42 = vadd.f32 %v1257_v16, %v1245_v29  ;;  %v1291_v0 = vrot.slane %v1285_v60, 2  ;;  %v1309_v3 = vrot.slane %v3095_v12, 2 }
 0x1ad   : > { %v876_v7 = vpack.c.bf16 %v873_v61, %v872_v1  ;;  %v1280_v41 = vadd.f32 %v1274_v46, %v1262_v55  ;;  %v1281_v5 = vadd.f32 %v1276_v49, %v1263_v26  ;;  %v3475_v11 = vperm.slane %v2918_v13, 3 }
 0x1ae   : > { %v1302_v34 = vmul.f32 %v3474_v45, %v3144_v33  ;;  %v1282_v63 = vadd.f32 %v1275_v20, %v1264_v42  ;;  %v1338_v58 = vperm.slane %v2920_v14, 3  ;;  %v1292_v31 = vsel %vm1253_vm12, %v1290_v37, %v1291_v0  ;;  %2044 = vmatmul.msk.bf16.vlgmr.msrb.gmra.mxu0 %vm703_vm0, %v3172_v2 }
 0x1af   : > { %v1320_v38 = vmul.f32 0.0, %v3475_v11  ;;  %2027 = vmatmul.msk.bf16.gmra.mxu3 %vm703_vm0, %v876_v7  ;;  %2046 = vmatmul.msk.bf16.gmra.mxu1 %vm703_vm0, %v876_v7  ;;  %v3476_v54 = vmov %v3475_v11  ;;  %v3477_v51 = vrot.slane %v3076_v24, 2  ;;  %v1298_v1 = vadd.f32 %v1292_v31, %v1280_v41 }
 0x1b0   : > { %v1308_v4 = vrot.slane %v1302_v34, 2  ;;  %v1322_v52 = vmul.f32 %v3476_v54, %v3079_v62  ;;  %v1339_v47 = vmul.f32 0.0, %v1338_v58  ;;  %v1340_v36 = vmul.f32 %v1338_v58, %v3079_v62 }
 0x1b1   : > { %v1294_v12 = vsel %vm1253_vm12, %v1291_v0, %v3477_v51  ;;  %v1327_v18 = vrot.slane %v1320_v38, 3  ;;  %v3478_v53 = vmov %v3477_v51  ;;  %v1341_v27 = vmul.f32 %v1338_v58, %v3144_v33 }
 0x1b2   : > { %v1310_v25 = vsel %vm1253_vm12, %v1308_v4, %v1309_v3  ;;  %v1299_v28 = vadd.f32 %v1294_v12, %v1281_v5  ;;  %v1300_v22 = vadd.f32 %v3478_v53, %v1282_v63  ;;  %v1330_v23 = vrot.slane %v1322_v52, 3 }
 0x1b3   : > { %v1356_v9 = vperm.slane %v2941_v35, 3  ;;  %v1316_v43 = vadd.f32 %v1310_v25, %v1298_v1  ;;  %v1345_v15 = vrot.slane %v1339_v47, 3  ;;  %v1346_v2 = vrot.slane %v1340_v36, 3 }
 0x1b4   : > { %v1317_v56 = vadd.f32 %v1309_v3, %v1299_v28  ;;  %v1318_v8 = vadd.f32 %v1309_v3, %v1300_v22  ;;  %v1331_v19 = vsel %vm1326_vm14, %v1327_v18, %v1330_v23  ;;  %v1348_v32 = vrot.slane %v1341_v27, 3 }
 0x1b5   : > { %v1357_v16 = vmul.f32 %v1356_v9, %v3079_v62  ;;  %v1335_v24 = vadd.f32 %v1327_v18, %v1316_v43  ;;  %v1358_v30 = vmul.f32 %v1356_v9, %v3144_v33  ;;  %v1347_v21 = vsel %vm1326_vm14, %v1345_v15, %v1346_v2 }
 0x1b6   : > { %v1336_v59 = vadd.f32 %v1331_v19, %v1317_v56  ;;  %v1337_v17 = vadd.f32 %v1330_v23, %v1318_v8  ;;  %v1349_v48 = vsel %vm1326_vm14, %v1346_v2, %v1348_v32  ;;  %v1359_v6 = vmul.f32 0.0, %v1356_v9 }
 0x1b7   : > { %v1363_v44 = vrot.slane %v1357_v16, 3  ;;  %v1353_v10 = vadd.f32 %v1347_v21, %v1335_v24  ;;  %v1364_v20 = vrot.slane %v1358_v30, 3  ;;  %v1374_v61 = vperm.slane %v2963_v50, 3 }
 0x1b8   : > { %v1354_v57 = vadd.f32 %v1349_v48, %v1336_v59  ;;  %v1355_v46 = vadd.f32 %v1348_v32, %v1337_v17  ;;  %v1366_v40 = vrot.slane %v1359_v6, 3  ;;  %v1392_v29 = vperm.slane %v2918_v13, 4 }
 0x1b9   : > { %v1365_v39 = vsel %vm1326_vm14, %v1363_v44, %v1364_v20  ;;  %v1411_v55 = vperm.slane %v2920_v14, 4  ;;  %v1429_v26 = vperm.slane %v2941_v35, 4  ;;  %v1447_v49 = vperm.slane %v2963_v50, 4 }
 0x1ba   : > { %v1367_v60 = vsel %vm1326_vm14, %v1364_v20, %v1366_v40  ;;  %v1371_v37 = vadd.f32 %v1365_v39, %v1353_v10  ;;  %v1373_v45 = vadd.f32 %v1366_v40, %v1355_v46  ;;  %v1375_v34 = vmul.f32 %v1374_v61, %v3144_v33 }
 0x1bb   : > { %v1372_v7 = vadd.f32 %v1367_v60, %v1354_v57  ;;  %v1376_v42 = vmul.f32 0.0, %v1374_v61  ;;  %v1393_v41 = vmul.f32 0.0, %v1392_v29  ;;  %v1395_v5 = vmul.f32 %v1392_v29, %v3079_v62 }
 0x1bc   : > { %v1381_v0 = vrot.slane %v1375_v34, 3  ;;  %v1412_v4 = vmul.f32 0.0, %v1411_v55  ;;  %v1413_v3 = vmul.f32 %v1411_v55, %v3079_v62  ;;  %v1414_v11 = vmul.f32 %v1411_v55, %v3144_v33 }
 0x1bd   : > { %v1382_v38 = vrot.slane %v1376_v42, 3  ;;  %v1400_v63 = vrot.slane %v1393_v41, 4  ;;  %v1403_v54 = vrot.slane %v1395_v5, 4  ;;  %v1430_v52 = vmul.f32 %v1429_v26, %v3079_v62 }
 0x1be   : > { %v1418_v58 = vrot.slane %v1412_v4, 4  ;;  %v1419_v31 = vrot.slane %v1413_v3, 4  ;;  %v1421_v51 = vrot.slane %v1414_v11, 4  ;;  %v1431_v12 = vmul.f32 %v1429_v26, %v3144_v33 }
 0x1bf   : > { %v1383_v25 = vsel %vm1326_vm14, %v1381_v0, %v1382_v38  ;;  %v1390_v18 = vadd.f32 %v1382_v38, %v1372_v7  ;;  %v1391_v1 = vadd.f32 %v1382_v38, %v1373_v45  ;;  %v1404_v28 = vsel %vm1399_vm15, %v1400_v63, %v1403_v54 }
 0x1c0   : > { %v1389_v53 = vadd.f32 %v1383_v25, %v1371_v37  ;;  %v1420_v22 = vsel %vm1399_vm15, %v1418_v58, %v1419_v31  ;;  %v1422_v23 = vsel %vm1399_vm15, %v1419_v31, %v1421_v51  ;;  %v1432_v47 = vmul.f32 0.0, %v1429_v26 }
 0x1c1   : > { %v1409_v36 = vadd.f32 %v1404_v28, %v1390_v18  ;;  %v1410_v27 = vadd.f32 %v1403_v54, %v1391_v1  ;;  %v1436_v9 = vrot.slane %v1430_v52, 4  ;;  %v1437_v43 = vrot.slane %v1431_v12, 4 }
 0x1c2   : > { %v1408_v56 = vadd.f32 %v1400_v63, %v1389_v53  ;;  %v1439_v8 = vrot.slane %v1432_v47, 4  ;;  %v1448_v19 = vmul.f32 %v1447_v49, %v3144_v33  ;;  %v1449_v15 = vmul.f32 0.0, %v1447_v49 }
 0x1c3   : > { %v1427_v2 = vadd.f32 %v1422_v23, %v1409_v36  ;;  %v1428_v32 = vadd.f32 %v1421_v51, %v1410_v27  ;;  %v1438_v16 = vsel %vm1399_vm15, %v1436_v9, %v1437_v43  ;;  %v1465_v24 = vperm.slane %v2918_v13, 5 }
 0x1c4   : > { %v1426_v59 = vadd.f32 %v1420_v22, %v1408_v56  ;;  %v1440_v17 = vsel %vm1399_vm15, %v1437_v43, %v1439_v8  ;;  %v1454_v30 = vrot.slane %v1448_v19, 4  ;;  %v1455_v21 = vrot.slane %v1449_v15, 4 }
 0x1c5   : > { %v1445_v48 = vadd.f32 %v1440_v17, %v1427_v2  ;;  %v1446_v6 = vadd.f32 %v1439_v8, %v1428_v32  ;;  %v1466_v44 = vmul.f32 0.0, %v1465_v24  ;;  %v1468_v10 = vmul.f32 %v1465_v24, %v3079_v62 }
 0x1c6   : > { %v1444_v57 = vadd.f32 %v1438_v16, %v1426_v59  ;;  %v1456_v46 = vsel %vm1399_vm15, %v1454_v30, %v1455_v21  ;;  %vm1472_vm1 = vcmask 1042432   ;;  %v1484_v20 = vperm.slane %v2920_v14, 5 }
 0x1c7   : > { %v1463_v40 = vadd.f32 %v1455_v21, %v1445_v48  ;;  %v1464_v61 = vadd.f32 %v1455_v21, %v1446_v6  ;;  %v1473_v29 = vrot.slane %v1466_v44, 5  ;;  %v1476_v39 = vrot.slane %v1468_v10, 5 }
 0x1c8   : > { %v1462_v55 = vadd.f32 %v1456_v46, %v1444_v57  ;;  %v1485_v26 = vmul.f32 0.0, %v1484_v20  ;;  %v1486_v49 = vmul.f32 %v1484_v20, %v3079_v62  ;;  %v1487_v60 = vmul.f32 %v1484_v20, %v3144_v33 }
 0x1c9   : > { %v1477_v37 = vsel %vm1472_vm1, %v1473_v29, %v1476_v39  ;;  %v1483_v45 = vadd.f32 %v1476_v39, %v1464_v61  ;;  %v1502_v34 = vperm.slane %v2941_v35, 5  ;;  %v1520_v7 = vperm.slane %v2963_v50, 5 }
 0x1ca   : > { %v1481_v42 = vadd.f32 %v1473_v29, %v1462_v55  ;;  %v1482_v41 = vadd.f32 %v1477_v37, %v1463_v40  ;;  %v1491_v5 = vrot.slane %v1485_v26, 5  ;;  %v1492_v0 = vrot.slane %v1486_v49, 5 }
 0x1cb   : > { %v1494_v4 = vrot.slane %v1487_v60, 5  ;;  %v1503_v3 = vmul.f32 %v1502_v34, %v3079_v62  ;;  %v1504_v11 = vmul.f32 %v1502_v34, %v3144_v33  ;;  %v1505_v38 = vmul.f32 0.0, %v1502_v34 }
 0x1cc   : > { %v1493_v63 = vsel %vm1472_vm1, %v1491_v5, %v1492_v0  ;;  %v1521_v54 = vmul.f32 %v1520_v7, %v3144_v33  ;;  %v1522_v52 = vmul.f32 0.0, %v1520_v7  ;;  %v1538_v58 = vperm.slane %v2918_v13, 6 }
 0x1cd   : > { %v1495_v31 = vsel %vm1472_vm1, %v1492_v0, %v1494_v4  ;;  %v1499_v51 = vadd.f32 %v1493_v63, %v1481_v42  ;;  %v1501_v12 = vadd.f32 %v1494_v4, %v1483_v45  ;;  %v1509_v25 = vrot.slane %v1503_v3, 5 }
 0x1ce   : > { %v1500_v18 = vadd.f32 %v1495_v31, %v1482_v41  ;;  %v1510_v1 = vrot.slane %v1504_v11, 5  ;;  %v1512_v28 = vrot.slane %v1505_v38, 5  ;;  %v1527_v53 = vrot.slane %v1521_v54, 5 }
 0x1cf   : > { %v1528_v22 = vrot.slane %v1522_v52, 5  ;;  %v1539_v23 = vmul.f32 0.0, %v1538_v58  ;;  %v1541_v47 = vmul.f32 %v1538_v58, %v3079_v62  ;;  %vm1545_vm2 = vcmask 1041408  }
 0x1d0   : > { %v1511_v36 = vsel %vm1472_vm1, %v1509_v25, %v1510_v1  ;;  %v1513_v27 = vsel %vm1472_vm1, %v1510_v1, %v1512_v28  ;;  %v1519_v9 = vadd.f32 %v1512_v28, %v1501_v12  ;;  %v1557_v43 = vperm.slane %v2920_v14, 6 }
 0x1d1   : > { %v1517_v56 = vadd.f32 %v1511_v36, %v1499_v51  ;;  %v1518_v8 = vadd.f32 %v1513_v27, %v1500_v18  ;;  %v1529_v19 = vsel %vm1472_vm1, %v1527_v53, %v1528_v22  ;;  %v1546_v15 = vrot.slane %v1539_v23, 6 }
 0x1d2   : > { %v1537_v2 = vadd.f32 %v1528_v22, %v1519_v9  ;;  %v1549_v32 = vrot.slane %v1541_v47, 6  ;;  %v1558_v16 = vmul.f32 0.0, %v1557_v43  ;;  %v1559_v24 = vmul.f32 %v1557_v43, %v3079_v62 }
 0x1d3   : > { %v1535_v59 = vadd.f32 %v1529_v19, %v1517_v56  ;;  %v1536_v17 = vadd.f32 %v1528_v22, %v1518_v8  ;;  %v1560_v30 = vmul.f32 %v1557_v43, %v3144_v33  ;;  %v1575_v21 = vperm.slane %v2941_v35, 6 }
 0x1d4   : > { %v1550_v48 = vsel %vm1545_vm2, %v1546_v15, %v1549_v32  ;;  %v1556_v6 = vadd.f32 %v1549_v32, %v1537_v2  ;;  %v1564_v44 = vrot.slane %v1558_v16, 6  ;;  %v1565_v10 = vrot.slane %v1559_v24, 6 }
 0x1d5   : > { %v1554_v57 = vadd.f32 %v1546_v15, %v1535_v59  ;;  %v1555_v46 = vadd.f32 %v1550_v48, %v1536_v17  ;;  %v1567_v20 = vrot.slane %v1560_v30, 6  ;;  %v1576_v40 = vmul.f32 %v1575_v21, %v3079_v62  ;;  %v2225_v15 = vld [vmem:[%s3479_s10] ss:$0 sm:$0xff] }
 0x1d6   : > { %v1566_v61 = vsel %vm1545_vm2, %v1564_v44, %v1565_v10  ;;  %v1577_v29 = vmul.f32 %v1575_v21, %v3144_v33  ;;  %v1578_v39 = vmul.f32 0.0, %v1575_v21  ;;  %v1593_v55 = vperm.slane %v2963_v50, 6 }
 0x1d7   : > { %v1568_v26 = vsel %vm1545_vm2, %v1565_v10, %v1567_v20  ;;  %v1572_v49 = vadd.f32 %v1566_v61, %v1554_v57  ;;  %v1574_v60 = vadd.f32 %v1567_v20, %v1556_v6  ;;  %v1582_v37 = vrot.slane %v1576_v40, 6 }
 0x1d8   : > { %v1573_v45 = vadd.f32 %v1568_v26, %v1555_v46  ;;  %v1583_v34 = vrot.slane %v1577_v29, 6  ;;  %v1585_v7 = vrot.slane %v1578_v39, 6  ;;  %v1594_v42 = vmul.f32 %v1593_v55, %v3144_v33 }
 0x1d9   : > { %v1595_v41 = vmul.f32 0.0, %v1593_v55  ;;  %v1611_v5 = vperm.slane %v2918_v13, 7  ;;  %vm1616_vm3 = vcmask 1040384   ;;  %v1626_v0 = vperm.slane %v2920_v14, 7 }
 0x1da   : > { %v1584_v4 = vsel %vm1545_vm2, %v1582_v37, %v1583_v34  ;;  %v1586_v50 = vsel %vm1545_vm2, %v1583_v34, %v1585_v7  ;;  %v1592_v3 = vadd.f32 %v1585_v7, %v1574_v60  ;;  %v1600_v11 = vrot.slane %v1594_v42, 6 }
 0x1db   : > { %v1590_v38 = vadd.f32 %v1584_v4, %v1572_v49  ;;  %v1591_v63 = vadd.f32 %v1586_v50, %v1573_v45  ;;  %v1601_v54 = vrot.slane %v1595_v41, 6  ;;  %v1612_v52 = vmul.f32 0.0, %v1611_v5 }
 0x1dc   : > { %v1613_v58 = vmul.f32 %v1611_v5, %v3079_v62  ;;  %v1627_v31 = vmul.f32 %v1626_v0, %v3079_v62  ;;  %v1628_v51 = vmul.f32 %v1626_v0, %v3144_v33  ;;  %v1640_v13 = vperm.slane %v2941_v35, 7 }
 0x1dd   : > { %v1602_v14 = vsel %vm1545_vm2, %v1600_v11, %v1601_v54  ;;  %v1609_v12 = vadd.f32 %v1601_v54, %v1591_v63  ;;  %v1610_v25 = vadd.f32 %v1601_v54, %v1592_v3  ;;  %v1617_v18 = vrot.slane %v1612_v52, 7 }
 0x1de   : > { %v1608_v1 = vadd.f32 %v1602_v14, %v1590_v38  ;;  %v1618_v28 = vrot.slane %v1613_v58, 7  ;;  %v1632_v53 = vrot.slane %v1628_v51, 7  ;;  %v1641_v22 = vmul.f32 %v1640_v13, %v3144_v33 }
 0x1df   : > { %v1642_v23 = vmul.f32 0.0, %v1640_v13  ;;  %v1631_v62 = vrot.slane %v1627_v31, 7  ;;  %vm1735_vm1 = vsmask.f32 7424 }
 0x1e0   : > { %v1619_v47 = vsel %vm1616_vm3, %v1617_v18, %v1618_v28  ;;  %v1623_v36 = vadd.f32 %v1617_v18, %v1608_v1  ;;  %v1625_v27 = vadd.f32 %v1618_v28, %v1610_v25  ;;  %v1645_v43 = vrot.slane %v1641_v22, 7 }
 0x1e1   : > { %v1624_v9 = vadd.f32 %v1619_v47, %v1609_v12  ;;  %v1646_v56 = vrot.slane %v1642_v23, 7  ;;  %v1633_v35 = vsel %vm1616_vm3, %v1631_v62, %v1632_v53 }
 0x1e2   : > { %v1637_v8 = vadd.f32 %v1631_v62, %v1623_v36  ;;  %v1639_v19 = vadd.f32 %v1632_v53, %v1625_v27 }
 0x1e3   : > { %v1638_v2 = vadd.f32 %v1633_v35, %v1624_v9  ;;  %v1647_v33 = vsel %vm1616_vm3, %v1645_v43, %v1646_v56 }
 0x1e4   : > { %v1651_v32 = vadd.f32 %v1645_v43, %v1637_v8  ;;  %v1653_v16 = vadd.f32 %v1646_v56, %v1639_v19 }
 0x1e5   : > { %v1652_v24 = vadd.f32 %v1647_v33, %v1638_v2 }
 0x1e6   : > { %v1658_v59 = vadd.f32 %v2225_v15, %v1651_v32  ;;  %v1660_v17 = vadd.f32 %v2225_v15, %v1653_v16  ;;  %v2226_v16 = vld [vmem:[%s3481_s24] ss:$0 sm:$0xff] }
 0x1e7   : > { %v1659_v30 = vadd.f32 %v2225_v15, %v1652_v24 }
 0x1e8   : > { %v2053_v21 = vmul.f32 -1.442695, %v1658_v59  ;;  %v2055_v48 = vmul.f32 -1.442695, %v1660_v17 }
 0x1e9   : > { %v2054_v6 = vmul.f32 -1.442695, %v1659_v30 }
 0x1ea   : > { %2247 = vpow2.f32 %v2053_v21 }
 0x1eb   : > { %2249 = vpow2.f32 %v2054_v6 }
 0x1ec   : > { %2251 = vpow2.f32 %v2055_v48 }
 0x1f0   : > { %v2248_v44 = vpop.eup %2247 }
 0x1f1   : > { %v2250_v10 = vpop.eup %2249  ;;  %v1670_v57 = vadd.f32 1.0, %v2248_v44 }
 0x1f2   : > { %v2252_v46 = vpop.eup %2251  ;;  %v1671_v20 = vadd.f32 1.0, %v2250_v10 }
 0x1f3   : > { %v1672_v40 = vadd.f32 1.0, %v2252_v46  ;;  %2253 = vrcp.f32 %v1670_v57  ;;  %vm1678_vm4 = vweird.f32 %v1670_v57  ;;  %v1682_v37 = vand.u32 2147483647, %v1670_v57 }
 0x1f4   : > { %2255 = vrcp.f32 %v1671_v20  ;;  %v1684_v45 = vand.u32 2147483648, %v1670_v57  ;;  %v1699_v42 = vand.u32 2147483648, %v1671_v20  ;;  %v1697_v0 = vand.u32 2147483647, %v1671_v20 }
 0x1f5   : > { %2257 = vrcp.f32 %v1672_v40  ;;  %v1714_v4 = vand.u32 2147483648, %v1672_v40  ;;  %v1712_v11 = vand.u32 2147483647, %v1672_v40  ;;  %vm1683_vm9 = vcmp.eq.f32.partialorder %v1682_v37, 8.507059e+37 }
 0x1f6   : > { %v1685_v38 = vor.u32 1.1754944e-38, %v1684_v45  ;;  %vm1693_vm10 = vweird.f32 %v1671_v20  ;;  %v1700_v52 = vor.u32 1.1754944e-38, %v1699_v42  ;;  %vm1708_vm12 = vweird.f32 %v1672_v40 }
 0x1f7   : > { %vm1698_vm13 = vcmp.eq.f32.partialorder %v1697_v0, 8.507059e+37  ;;  %v1715_v13 = vor.u32 1.1754944e-38, %v1714_v4  ;;  %vm1713_vm15 = vcmp.eq.f32.partialorder %v1712_v11, 8.507059e+37 }
 0x1f9   : > { %v2254_v61 = vpop.eup %2253 }
 0x1fa   : > { %v2256_v29 = vpop.eup %2255  ;;  %v1674_v39 = vmul.f32 %v2254_v61, %v1670_v57  ;;  %vm1679_vm5 = vweird.f32 %v2254_v61 }
 0x1fb   : > { %v2258_v55 = vpop.eup %2257  ;;  %v1689_v26 = vmul.f32 %v2256_v29, %v1671_v20  ;;  %vm1694_vm6 = vweird.f32 %v2256_v29  ;;  %vm1680_vm8 = vmor %vm1678_vm4, %vm1679_vm5 }
 0x1fc   : > { %v1675_v49 = vsub.f32 1.0, %v1674_v39  ;;  %v1704_v60 = vmul.f32 %v2258_v55, %v1672_v40  ;;  %vm1709_vm7 = vweird.f32 %v2258_v55  ;;  %vm1695_vm11 = vmor %vm1693_vm10, %vm1694_vm6 }
 0x1fd   : > { %v1690_v34 = vsub.f32 1.0, %v1689_v26  ;;  %vm1710_vm14 = vmor %vm1708_vm12, %vm1709_vm7 }
 0x1fe   : > { %v1676_v7 = vmul.f32 %v2254_v61, %v1675_v49  ;;  %v1705_v41 = vsub.f32 1.0, %v1704_v60 }
 0x1ff   : > { %v1691_v5 = vmul.f32 %v2256_v29, %v1690_v34 }
 0x200   : > { %v1677_v50 = vadd.f32 %v2254_v61, %v1676_v7  ;;  %v1706_v3 = vmul.f32 %v2258_v55, %v1705_v41 }
 0x201   : > { %v1692_v63 = vadd.f32 %v2256_v29, %v1691_v5 }
 0x202   : > { %v1681_v54 = vsel %vm1680_vm8, %v2254_v61, %v1677_v50  ;;  %v1707_v58 = vadd.f32 %v2258_v55, %v1706_v3 }
 0x203   : > { %v1686_v31 = vsel %vm1683_vm9, %v1685_v38, %v1681_v54  ;;  %v1696_v51 = vsel %vm1695_vm11, %v2256_v29, %v1692_v63 }
 0x204   : > { %v1701_v14 = vsel %vm1698_vm13, %v1700_v52, %v1696_v51  ;;  %v1711_v12 = vsel %vm1710_vm14, %v2258_v55, %v1707_v58  ;;  %v1718_v18 = vmul.f32 %v1686_v31, %v1658_v59 }
 0x205   : > { %v1716_v25 = vsel %vm1713_vm15, %v1715_v13, %v1711_v12  ;;  %v1719_v1 = vmul.f32 %v1701_v14, %v1659_v30 }
 0x206   : > { %v1720_v28 = vmul.f32 %v1716_v25, %v1660_v17 }
 0x207   : > { %v1721_v53 = vpack.c.bf16 %v1719_v1, %v1718_v18 }
 0x208   : > { %v1722_v22 = vpack.c.bf16 %v1720_v28, %v1720_v28 }
 0x209   : > { %v1739_v23 = vshll.u32 %v1721_v53, 16  ;;  %v1737_v36 = vshrl.u32 %v1721_v53, 16 }
 0x20a   : > { %v1744_v47 = vshll.u32 %v1722_v22, 16 }
 0x20b   : > { %v1741_v27 = vrot.slane %v1739_v23, 1 }
 0x20c   : > { %v1746_v62 = vrot.slane %v1744_v47, 1 }
 0x20d   : > { %v1742_v9 = vor.u32 %v1741_v27, %v1737_v36 }
 0x20f   : > { %v1747_v43 = vsel %vm1735_vm1, %v1742_v9, %v1746_v62 }
 0x210   : > { %2072 = vmatmul.msk.bf16.vlgmr.msra.gmra.mxu2 %vm703_vm0, %v1747_v43 }
 0x21b   : > { %v931_v56 = vpop.f32.mrf.mxu0 }
 0x223   : > { %v933_v35 = vpop.f32.mrf.mxu0 }
 0x22b   : > { %v991_v19 = vpop.f32.mrf.mxu0 }
 0x22c   : > { %v1001_v8 = vpop.f32.mrf.mxu1 }
 0x232   : > { %v941_v15 = vpop.f32.mrf.mxu3 }
 0x233   : > { %v993_v33 = vpop.f32.mrf.mxu0 }
 0x234   : > { %v1003_v2 = vpop.f32.mrf.mxu1 }
 0x23a   : > { %v943_v32 = vpop.f32.mrf.mxu3 }
 0x293   : > { %v1784_v24 = vpop.f32.mrf.mxu2 }
 0x294   : > { %v1785_v59 = vadd.f32 %v2226_v16, %v1784_v24 }
 0x296   : > { %1789 = vst.msk [vmem:[%s651_s25] sm:$0xff] %vm703_vm0, %v1785_v59 }
 0x29b   : > { %v1786_v17 = vpop.f32.mrf.mxu2 }
 0x29c   : > { %v1787_v30 = vadd.f32 %v2226_v16, %v1786_v17 }
 0x29e   : > { %1790 = vst.msk [vmem:[%s651_s25 + $0x8] sm:$0xff] %vm703_vm0, %v1787_v30 }
 0x29f   : > { %2496 = shalt.err (!%p2493_p12)
}
 0x2a0   : > { %s2573_s1 = smov 128   ;;  %s2574_s20 = smov 8  }
 0x2a1   : > { %2124 = dma.vmem_to_hbm [thread:$0]  (%p2734_p7), %s1807_s16, 256, %s1809_s22, %s1792_s19, %s2573_s1, %s2573_s1, %s2574_s20  }
 0x2a2 PF: > { %s3485_s10 = sld [smem:[#allocation20_spill]] }
 0x2a3   : > { %s3487_s7 = sld [smem:[#allocation23_spill]] }
 0x2a8   : > { %s1823_s29 = sand.u32 1, %s3485_s10  }
 0x2a9   : > { %p3488_p13 = scmp.ge.s32.totalorder %s3487_s7, 2  ;;  %s1824_s24 = scalar_lea.sflag [#allocation4], %s1823_s29 }
 0x2ab   : > { %p2150_p0 = pnand %p3488_p13, %p2690_p6 }
 0x2ad   : > { %p2151_p3 = pneg %p2150_p0 }
 0x2af   : > { %2538 = dma.done.wait (%p2151_p3), %s1824_s24, 256  }
 0x2b0   : > { %2540 = vsyncadd (%p2151_p3), %s1824_s24, 4294967040  ;;  %s34_s30 = sadd.s32 1, %s3487_s7   ;;  %s3489_s23 = sld [smem:[#allocation27_spill]] }
 0x2b1   : > { %p31_p5 = scmp.ge.s32.totalorder %s34_s30, 4   ;;  %s3490_s28 = sld [smem:[#allocation22_spill]] }
 0x2b2   : > { %s3491_s29 = sld [smem:[#allocation25_spill]]  ;;  %s3492_s25 = smov %s2547_s26 }
 0x2b3   : > { %s3493_s26 = smov %s2551_s27  ;;  %33 = sbr.rel (!%p31_p5) target bundleno = 21 (0x15), region = 157 }
 0x2b6   : > { %s3494_s27 = smov %s3489_s23 }
 0x2b8   :  { %1830 = vsyncpa [#allocation3], 1 }
 0x2b9   :  { %1832 = vsyncpa [#allocation3 + $0x1], 1 }
 0x2ba   :  { %1833 = vsyncpa [#allocation6], 1 }
 0x2bb   :  { %1835 = vsyncpa [#allocation6 + $0x1], 1 }
 0x2bc   :  { %1836 = vsyncpa [#allocation9], 1 }
 0x2bd   :  { %1837 = vsyncpa [#allocation12], 1 }
 0x2be   :  { %1838 = vsyncpa [#allocation4], 1 }
 0x2bf   :  { %1840 = vsyncpa [#allocation4 + $0x1], 1 }

</bundles_post_ra>
